<compile_context>
chip_gen: v5e
topology: v5e:2x2
jax: 0.10.0
libtpu: 0.0.40
codegen_flags: <defaults>
</compile_context>

<pallas_src>
import jax
import jax.numpy as jnp
from jax.experimental import pallas as pl
from jax.experimental.pallas import tpu as pltpu

NUMBER_OF_LABELS = 10
LANE = 128            # TPU vreg lane width
MAX_TILE_B = 1024     # batch rows per grid step (sweep 1024-2048 if desired)


def _round_up(x, m):
    return ((x + m - 1) // m) * m


def _mlp_kernel(x_ref,
                w0_ref, b0_ref,
                w1_ref, b1_ref,
                w2_ref, b2_ref,
                w3_ref, b3_ref,
                w4_ref, b4_ref,
                w5_ref, b5_ref,
                out_ref):
    """Lane-padded MLP forward (5 sigmoid layers + linear + log_softmax) for one batch tile."""

    def dense_f32(h_bf16, w_ref, b_ref):
        # bf16 MXU inputs, f32 accumulation, f32 bias add.
        return jnp.dot(h_bf16, w_ref[...],
                       preferred_element_type=jnp.float32) + b_ref[...]

    # x arrives in its native dtype (no wrapper-side cast/pad HBM pass); cast in-register.
    h = x_ref[...].astype(jnp.bfloat16)
    h = jax.nn.sigmoid(dense_f32(h, w0_ref, b0_ref)).astype(jnp.bfloat16)
    h = jax.nn.sigmoid(dense_f32(h, w1_ref, b1_ref)).astype(jnp.bfloat16)
    h = jax.nn.sigmoid(dense_f32(h, w2_ref, b2_ref)).astype(jnp.bfloat16)
    h = jax.nn.sigmoid(dense_f32(h, w3_ref, b3_ref)).astype(jnp.bfloat16)
    h = jax.nn.sigmoid(dense_f32(h, w4_ref, b4_ref)).astype(jnp.bfloat16)
    logits = dense_f32(h, w5_ref, b5_ref)                              # f32, (tile_b, 128)

    # log_softmax along the lane axis; padded columns carry ~-1e9 so exp() == 0 there
    # and the 10 real columns are unchanged.
    m = jnp.max(logits, axis=-1, keepdims=True)
    shifted = logits - m
    lse = jnp.log(jnp.sum(jnp.exp(shifted), axis=-1, keepdims=True))
    out_ref[...] = (shifted - lse).astype(out_ref.dtype)


def _pack_params(params):
    """Pad every layer to 128 output lanes with ZERO weights/bias (so padded activations
    sigmoid(0)=0.5 never contaminate real outputs: their outgoing weight rows are zero).
    Weights are stored bf16 for the MXU, biases stay f32.  The final layer's padded bias
    columns are -1e9 so the in-kernel log_softmax ignores them."""
    packed = []
    n_layers = len(params)
    for li, (w, b) in enumerate(params):
        in_d, out_d = w.shape
        in_p = in_d if li == 0 else _round_up(in_d, LANE)
        out_p = _round_up(out_d, LANE)
        w_p = jnp.zeros((in_p, out_p), jnp.float32).at[:in_d, :out_d].set(w)
        if li == n_layers - 1:
            b_p = jnp.full((1, out_p), -1e9, jnp.float32).at[0, :out_d].set(b)
        else:
            b_p = jnp.zeros((1, out_p), jnp.float32).at[0, :out_d].set(b)
        packed.append(w_p.astype(jnp.bfloat16))   # MXU input
        packed.append(b_p)                        # (1, out_p) f32
    return packed


def _pallas_forward(x2d, flat_params, *, tile_b, n_tiles,
                    core_parallel, single_buffer_params):
    B, input_size = x2d.shape

    x_spec = pl.BlockSpec((tile_b, input_size), lambda i: (i, 0))
    if single_buffer_params:
        # Constant block index across the grid -> a single buffer is enough: fetched
        # once, VMEM-resident for every batch tile (saves ~0.55 MiB of double-buffers).
        param_specs = [pl.BlockSpec(p.shape, lambda i: (0, 0),
                                    pipeline_mode=pl.Buffered(1))
                       for p in flat_params]
    else:
        param_specs = [pl.BlockSpec(p.shape, lambda i: (0, 0)) for p in flat_params]
    out_spec = pl.BlockSpec((tile_b, LANE), lambda i: (i, 0))

    param_bytes = sum(int(p.size) * p.dtype.itemsize for p in flat_params)
    # Right-sized VMEM request: double-buffered x tile + out tile + params + headroom,
    # floored at the 32 MiB default scoped limit; never the full 64 MiB of v7x.
    footprint = (2 * tile_b * input_size * x2d.dtype.itemsize
                 + 2 * tile_b * LANE * 4
                 + 2 * param_bytes
                 + (4 << 20))
    vmem_limit = int(min(64 << 20, max(32 << 20, footprint)))

    # CORE_PARALLEL splits batch tiles across v7x's two TensorCores; plain PARALLEL
    # otherwise (near-zero codegen effect but harmless).
    dim_sem = (pltpu.CORE_PARALLEL,) if core_parallel else (pltpu.PARALLEL,)

    flops = 2 * B * (input_size * LANE + 5 * LANE * LANE)
    transcendentals = B * 6 * LANE                        # 5 sigmoids + softmax exp
    bytes_accessed = (int(x2d.size) * x2d.dtype.itemsize
                      + B * LANE * 4
                      + param_bytes)

    return pl.pallas_call(
        _mlp_kernel,
        out_shape=jax.ShapeDtypeStruct((B, LANE), jnp.float32),
        grid=(n_tiles,),
        in_specs=[x_spec] + param_specs,
        out_specs=out_spec,
        compiler_params=pltpu.CompilerParams(
            dimension_semantics=dim_sem,
            vmem_limit_bytes=vmem_limit),
        cost_estimate=pl.CostEstimate(
            flops=flops,
            transcendentals=transcendentals,
            bytes_accessed=bytes_accessed),
    )(x2d, *flat_params)


def model_f_forward(x, params):
    """x: (B, C, H, W) or (B, input_size); params: list of (W, b) with W of shape (in, out)."""
    input_size = params[0][0].shape[0]
    x2d = x.reshape(-1, input_size)
    B = x2d.shape[0]

    # Batch tiling: one full-array block for small batches (no row padding), otherwise
    # MAX_TILE_B-row tiles with a bounds-masked edge block (no padding of B either way).
    tile_b = B if B <= MAX_TILE_B else MAX_TILE_B
    n_tiles = pl.cdiv(B, tile_b)

    flat_params = _pack_params(params)

    try:
        out_padded = _pallas_forward(
            x2d, flat_params, tile_b=tile_b, n_tiles=n_tiles,
            core_parallel=(n_tiles > 1),
            single_buffer_params=True)
        if hasattr(out_padded, "block_until_ready"):
            out_padded = out_padded.block_until_ready()   # surface async failures here
    except Exception:
        # Conservative fallback for chips / jax versions that reject CORE_PARALLEL or
        # single-buffered (pl.Buffered(1)) parameter blocks.
        out_padded = _pallas_forward(
            x2d, flat_params, tile_b=tile_b, n_tiles=n_tiles,
            core_parallel=False,
            single_buffer_params=False)

    # strip the zero-padded output lanes (only the 10 real label columns are meaningful)
    return out_padded[:, :NUMBER_OF_LABELS]


def init_params(key, input_size):
    """Deterministic init matching ModelF layer shapes; W stored as (in, out)."""
    dims = [input_size, 128, 64, 10, 10, 10, NUMBER_OF_LABELS]
    params = []
    for i in range(len(dims) - 1):
        key, kw, kb = jax.random.split(key, 3)
        bound = 1.0 / jnp.sqrt(dims[i])
        w = jax.random.uniform(kw, (dims[i], dims[i + 1]), jnp.float32, -bound, bound)
        b = jax.random.uniform(kb, (dims[i + 1],), jnp.float32, -bound, bound)
        params.append((w, b))
    return params


def _reference_forward(x, params):
    """Pure-JAX f32 reference of ModelF.forward."""
    input_size = params[0][0].shape[0]
    h = x.reshape(-1, input_size).astype(jnp.float32)
    for li, (w, b) in enumerate(params):
        h = h @ w + b
        if li < len(params) - 1:
            h = jax.nn.sigmoid(h)
    return jax.nn.log_softmax(h, axis=-1)


if __name__ == "__main__":
    key = jax.random.PRNGKey(0)
    k_x, k_p = jax.random.split(key)

    # Small image-like input: batch=2, channels=4, spatial=16x16 -> input_size=1024
    B, C, H, W = 2, 4, 16, 16
    input_size = C * H * W
    x = jax.random.normal(k_x, (B, C, H, W), jnp.float32)
    params = init_params(k_p, input_size)

    out = jax.block_until_ready(model_f_forward(x, params))

    assert out.shape == (B, NUMBER_OF_LABELS)
    # log_softmax rows should exponentiate-sum to 1
    assert jnp.allclose(jnp.sum(jnp.exp(out), axis=1), 1.0, atol=1e-3)
    # bf16 MXU inputs with f32 accumulation -> loose tolerance vs f32 reference
    ref = _reference_forward(x, params)
    assert jnp.allclose(out, ref, atol=5e-2, rtol=5e-2), float(jnp.max(jnp.abs(out - ref)))

    print("KERNEL_OK")
</pallas_src>

<mosaic_0001>
module attributes {stable_mosaic.version = 11 : i64} {
  func.func @_mlp_kernel(%arg0: i32, %arg1: memref<2x1024xf32, #tpu.memory_space<vmem>>, %arg2: memref<1024x128xbf16, #tpu.memory_space<vmem>>, %arg3: memref<1x128xf32, #tpu.memory_space<vmem>>, %arg4: memref<128x128xbf16, #tpu.memory_space<vmem>>, %arg5: memref<1x128xf32, #tpu.memory_space<vmem>>, %arg6: memref<128x128xbf16, #tpu.memory_space<vmem>>, %arg7: memref<1x128xf32, #tpu.memory_space<vmem>>, %arg8: memref<128x128xbf16, #tpu.memory_space<vmem>>, %arg9: memref<1x128xf32, #tpu.memory_space<vmem>>, %arg10: memref<128x128xbf16, #tpu.memory_space<vmem>>, %arg11: memref<1x128xf32, #tpu.memory_space<vmem>>, %arg12: memref<128x128xbf16, #tpu.memory_space<vmem>>, %arg13: memref<1x128xf32, #tpu.memory_space<vmem>>, %arg14: memref<2x128xf32, #tpu.memory_space<vmem>>) attributes {dimension_semantics = [#tpu.dimension_semantics<parallel>], iteration_bounds = array<i64: 1>, scalar_prefetch = 0 : i64, scratch_operands = 0 : i64, tpu.core_type = #tpu.core_type<tc>, window_params = [{transform_indices = @transform_0, window_bounds = array<i64: 2, 1024>}, {pipeline_mode = #tpu.pipeline_mode<synchronous>, transform_indices = @transform_1, window_bounds = array<i64: 1024, 128>}, {pipeline_mode = #tpu.pipeline_mode<synchronous>, transform_indices = @transform_2, window_bounds = array<i64: 1, 128>}, {pipeline_mode = #tpu.pipeline_mode<synchronous>, transform_indices = @transform_3, window_bounds = array<i64: 128, 128>}, {pipeline_mode = #tpu.pipeline_mode<synchronous>, transform_indices = @transform_4, window_bounds = array<i64: 1, 128>}, {pipeline_mode = #tpu.pipeline_mode<synchronous>, transform_indices = @transform_5, window_bounds = array<i64: 128, 128>}, {pipeline_mode = #tpu.pipeline_mode<synchronous>, transform_indices = @transform_6, window_bounds = array<i64: 1, 128>}, {pipeline_mode = #tpu.pipeline_mode<synchronous>, transform_indices = @transform_7, window_bounds = array<i64: 128, 128>}, {pipeline_mode = #tpu.pipeline_mode<synchronous>, transform_indices = @transform_8, window_bounds = array<i64: 1, 128>}, {pipeline_mode = #tpu.pipeline_mode<synchronous>, transform_indices = @transform_9, window_bounds = array<i64: 128, 128>}, {pipeline_mode = #tpu.pipeline_mode<synchronous>, transform_indices = @transform_10, window_bounds = array<i64: 1, 128>}, {pipeline_mode = #tpu.pipeline_mode<synchronous>, transform_indices = @transform_11, window_bounds = array<i64: 128, 128>}, {pipeline_mode = #tpu.pipeline_mode<synchronous>, transform_indices = @transform_12, window_bounds = array<i64: 1, 128>}, {transform_indices = @transform_13, window_bounds = array<i64: 2, 128>}]} {
    %c0 = arith.constant 0 : index
    %c0_0 = arith.constant 0 : index
    %0 = vector.load %arg1[%c0, %c0_0] : memref<2x1024xf32, #tpu.memory_space<vmem>>, vector<2x1024xf32>
    %1 = arith.truncf %0 : vector<2x1024xf32> to vector<2x1024xbf16>
    %c0_1 = arith.constant 0 : index
    %c0_2 = arith.constant 0 : index
    %2 = vector.load %arg2[%c0_1, %c0_2] : memref<1024x128xbf16, #tpu.memory_space<vmem>>, vector<1024x128xbf16>
    %cst = arith.constant dense<0.000000e+00> : vector<2x128xf32>
    %3 = tpu.matmul %1, %2, %cst {dimension_numbers = #tpu.dot_dimension_numbers<[1], [0], [0], [1], [0, 0, 1, 1], [], []>} : vector<2x1024xbf16>, vector<1024x128xbf16>, vector<2x128xf32> -> vector<2x128xf32>
    %c0_3 = arith.constant 0 : index
    %c0_4 = arith.constant 0 : index
    %4 = vector.load %arg3[%c0_3, %c0_4] : memref<1x128xf32, #tpu.memory_space<vmem>>, vector<1x128xf32>
    %5 = vector.broadcast %4 : vector<1x128xf32> to vector<2x128xf32>
    %6 = arith.addf %3, %5 : vector<2x128xf32>
    %7 = arith.negf %6 : vector<2x128xf32>
    %8 = math.exp %7 : vector<2x128xf32>
    %cst_5 = arith.constant 1.000000e+00 : f32
    %9 = vector.broadcast %cst_5 : f32 to vector<2x128xf32>
    %10 = arith.addf %9, %8 : vector<2x128xf32>
    %11 = arith.divf %9, %10 : vector<2x128xf32>
    %12 = arith.truncf %11 : vector<2x128xf32> to vector<2x128xbf16>
    %c0_6 = arith.constant 0 : index
    %c0_7 = arith.constant 0 : index
    %13 = vector.load %arg4[%c0_6, %c0_7] : memref<128x128xbf16, #tpu.memory_space<vmem>>, vector<128x128xbf16>
    %cst_8 = arith.constant dense<0.000000e+00> : vector<2x128xf32>
    %14 = tpu.matmul %12, %13, %cst_8 {dimension_numbers = #tpu.dot_dimension_numbers<[1], [0], [0], [1], [0, 0, 1, 1], [], []>} : vector<2x128xbf16>, vector<128x128xbf16>, vector<2x128xf32> -> vector<2x128xf32>
    %c0_9 = arith.constant 0 : index
    %c0_10 = arith.constant 0 : index
    %15 = vector.load %arg5[%c0_9, %c0_10] : memref<1x128xf32, #tpu.memory_space<vmem>>, vector<1x128xf32>
    %16 = vector.broadcast %15 : vector<1x128xf32> to vector<2x128xf32>
    %17 = arith.addf %14, %16 : vector<2x128xf32>
    %18 = arith.negf %17 : vector<2x128xf32>
    %19 = math.exp %18 : vector<2x128xf32>
    %cst_11 = arith.constant 1.000000e+00 : f32
    %20 = vector.broadcast %cst_11 : f32 to vector<2x128xf32>
    %21 = arith.addf %20, %19 : vector<2x128xf32>
    %22 = arith.divf %20, %21 : vector<2x128xf32>
    %23 = arith.truncf %22 : vector<2x128xf32> to vector<2x128xbf16>
    %c0_12 = arith.constant 0 : index
    %c0_13 = arith.constant 0 : index
    %24 = vector.load %arg6[%c0_12, %c0_13] : memref<128x128xbf16, #tpu.memory_space<vmem>>, vector<128x128xbf16>
    %cst_14 = arith.constant dense<0.000000e+00> : vector<2x128xf32>
    %25 = tpu.matmul %23, %24, %cst_14 {dimension_numbers = #tpu.dot_dimension_numbers<[1], [0], [0], [1], [0, 0, 1, 1], [], []>} : vector<2x128xbf16>, vector<128x128xbf16>, vector<2x128xf32> -> vector<2x128xf32>
    %c0_15 = arith.constant 0 : index
    %c0_16 = arith.constant 0 : index
    %26 = vector.load %arg7[%c0_15, %c0_16] : memref<1x128xf32, #tpu.memory_space<vmem>>, vector<1x128xf32>
    %27 = vector.broadcast %26 : vector<1x128xf32> to vector<2x128xf32>
    %28 = arith.addf %25, %27 : vector<2x128xf32>
    %29 = arith.negf %28 : vector<2x128xf32>
    %30 = math.exp %29 : vector<2x128xf32>
    %cst_17 = arith.constant 1.000000e+00 : f32
    %31 = vector.broadcast %cst_17 : f32 to vector<2x128xf32>
    %32 = arith.addf %31, %30 : vector<2x128xf32>
    %33 = arith.divf %31, %32 : vector<2x128xf32>
    %34 = arith.truncf %33 : vector<2x128xf32> to vector<2x128xbf16>
    %c0_18 = arith.constant 0 : index
    %c0_19 = arith.constant 0 : index
    %35 = vector.load %arg8[%c0_18, %c0_19] : memref<128x128xbf16, #tpu.memory_space<vmem>>, vector<128x128xbf16>
    %cst_20 = arith.constant dense<0.000000e+00> : vector<2x128xf32>
    %36 = tpu.matmul %34, %35, %cst_20 {dimension_numbers = #tpu.dot_dimension_numbers<[1], [0], [0], [1], [0, 0, 1, 1], [], []>} : vector<2x128xbf16>, vector<128x128xbf16>, vector<2x128xf32> -> vector<2x128xf32>
    %c0_21 = arith.constant 0 : index
    %c0_22 = arith.constant 0 : index
    %37 = vector.load %arg9[%c0_21, %c0_22] : memref<1x128xf32, #tpu.memory_space<vmem>>, vector<1x128xf32>
    %38 = vector.broadcast %37 : vector<1x128xf32> to vector<2x128xf32>
    %39 = arith.addf %36, %38 : vector<2x128xf32>
    %40 = arith.negf %39 : vector<2x128xf32>
    %41 = math.exp %40 : vector<2x128xf32>
    %cst_23 = arith.constant 1.000000e+00 : f32
    %42 = vector.broadcast %cst_23 : f32 to vector<2x128xf32>
    %43 = arith.addf %42, %41 : vector<2x128xf32>
    %44 = arith.divf %42, %43 : vector<2x128xf32>
    %45 = arith.truncf %44 : vector<2x128xf32> to vector<2x128xbf16>
    %c0_24 = arith.constant 0 : index
    %c0_25 = arith.constant 0 : index
    %46 = vector.load %arg10[%c0_24, %c0_25] : memref<128x128xbf16, #tpu.memory_space<vmem>>, vector<128x128xbf16>
    %cst_26 = arith.constant dense<0.000000e+00> : vector<2x128xf32>
    %47 = tpu.matmul %45, %46, %cst_26 {dimension_numbers = #tpu.dot_dimension_numbers<[1], [0], [0], [1], [0, 0, 1, 1], [], []>} : vector<2x128xbf16>, vector<128x128xbf16>, vector<2x128xf32> -> vector<2x128xf32>
    %c0_27 = arith.constant 0 : index
    %c0_28 = arith.constant 0 : index
    %48 = vector.load %arg11[%c0_27, %c0_28] : memref<1x128xf32, #tpu.memory_space<vmem>>, vector<1x128xf32>
    %49 = vector.broadcast %48 : vector<1x128xf32> to vector<2x128xf32>
    %50 = arith.addf %47, %49 : vector<2x128xf32>
    %51 = arith.negf %50 : vector<2x128xf32>
    %52 = math.exp %51 : vector<2x128xf32>
    %cst_29 = arith.constant 1.000000e+00 : f32
    %53 = vector.broadcast %cst_29 : f32 to vector<2x128xf32>
    %54 = arith.addf %53, %52 : vector<2x128xf32>
    %55 = arith.divf %53, %54 : vector<2x128xf32>
    %56 = arith.truncf %55 : vector<2x128xf32> to vector<2x128xbf16>
    %c0_30 = arith.constant 0 : index
    %c0_31 = arith.constant 0 : index
    %57 = vector.load %arg12[%c0_30, %c0_31] : memref<128x128xbf16, #tpu.memory_space<vmem>>, vector<128x128xbf16>
    %cst_32 = arith.constant dense<0.000000e+00> : vector<2x128xf32>
    %58 = tpu.matmul %56, %57, %cst_32 {dimension_numbers = #tpu.dot_dimension_numbers<[1], [0], [0], [1], [0, 0, 1, 1], [], []>} : vector<2x128xbf16>, vector<128x128xbf16>, vector<2x128xf32> -> vector<2x128xf32>
    %c0_33 = arith.constant 0 : index
    %c0_34 = arith.constant 0 : index
    %59 = vector.load %arg13[%c0_33, %c0_34] : memref<1x128xf32, #tpu.memory_space<vmem>>, vector<1x128xf32>
    %60 = vector.broadcast %59 : vector<1x128xf32> to vector<2x128xf32>
    %61 = arith.addf %58, %60 : vector<2x128xf32>
    %cst_35 = arith.constant dense<0xFF800000> : vector<2xf32>
    %62 = vector.multi_reduction <maximumf>, %61, %cst_35 [1] : vector<2x128xf32> to vector<2xf32>
    %63 = vector.shape_cast %62 : vector<2xf32> to vector<2x1xf32>
    %64 = vector.broadcast %63 : vector<2x1xf32> to vector<2x128xf32>
    %65 = arith.subf %61, %64 : vector<2x128xf32>
    %66 = math.exp %65 : vector<2x128xf32>
    %cst_36 = arith.constant dense<0.000000e+00> : vector<2xf32>
    %67 = vector.multi_reduction <add>, %66, %cst_36 [1] : vector<2x128xf32> to vector<2xf32>
    %68 = vector.shape_cast %67 : vector<2xf32> to vector<2x1xf32>
    %69 = math.log %68 : vector<2x1xf32>
    %70 = vector.broadcast %69 : vector<2x1xf32> to vector<2x128xf32>
    %71 = arith.subf %65, %70 : vector<2x128xf32>
    %c0_37 = arith.constant 0 : index
    %c0_38 = arith.constant 0 : index
    %72 = vector.load %arg14[%c0_37, %c0_38] : memref<2x128xf32, #tpu.memory_space<vmem>>, vector<2x128xf32>
    tpu.vector_store %arg14[%c0_37, %c0_38], %71 {strides = array<i32>} : memref<2x128xf32, #tpu.memory_space<vmem>>, vector<2x128xf32>,
    return
  }
  func.func @transform_0(%arg0: i32) -> (i32, i32) {
    %c0_i32 = arith.constant 0 : i32
    %c0_i32_0 = arith.constant 0 : i32
    return %arg0, %c0_i32 : i32, i32
  }
  func.func @transform_1(%arg0: i32) -> (i32, i32) {
    %c0_i32 = arith.constant 0 : i32
    %c0_i32_0 = arith.constant 0 : i32
    %c0_i32_1 = arith.constant 0 : i32
    return %c0_i32, %c0_i32_0 : i32, i32
  }
  func.func @transform_2(%arg0: i32) -> (i32, i32) {
    %c0_i32 = arith.constant 0 : i32
    %c0_i32_0 = arith.constant 0 : i32
    %c0_i32_1 = arith.constant 0 : i32
    return %c0_i32, %c0_i32_0 : i32, i32
  }
  func.func @transform_3(%arg0: i32) -> (i32, i32) {
    %c0_i32 = arith.constant 0 : i32
    %c0_i32_0 = arith.constant 0 : i32
    %c0_i32_1 = arith.constant 0 : i32
    return %c0_i32, %c0_i32_0 : i32, i32
  }
  func.func @transform_4(%arg0: i32) -> (i32, i32) {
    %c0_i32 = arith.constant 0 : i32
    %c0_i32_0 = arith.constant 0 : i32
    %c0_i32_1 = arith.constant 0 : i32
    return %c0_i32, %c0_i32_0 : i32, i32
  }
  func.func @transform_5(%arg0: i32) -> (i32, i32) {
    %c0_i32 = arith.constant 0 : i32
    %c0_i32_0 = arith.constant 0 : i32
    %c0_i32_1 = arith.constant 0 : i32
    return %c0_i32, %c0_i32_0 : i32, i32
  }
  func.func @transform_6(%arg0: i32) -> (i32, i32) {
    %c0_i32 = arith.constant 0 : i32
    %c0_i32_0 = arith.constant 0 : i32
    %c0_i32_1 = arith.constant 0 : i32
    return %c0_i32, %c0_i32_0 : i32, i32
  }
  func.func @transform_7(%arg0: i32) -> (i32, i32) {
    %c0_i32 = arith.constant 0 : i32
    %c0_i32_0 = arith.constant 0 : i32
    %c0_i32_1 = arith.constant 0 : i32
    return %c0_i32, %c0_i32_0 : i32, i32
  }
  func.func @transform_8(%arg0: i32) -> (i32, i32) {
    %c0_i32 = arith.constant 0 : i32
    %c0_i32_0 = arith.constant 0 : i32
    %c0_i32_1 = arith.constant 0 : i32
    return %c0_i32, %c0_i32_0 : i32, i32
  }
  func.func @transform_9(%arg0: i32) -> (i32, i32) {
    %c0_i32 = arith.constant 0 : i32
    %c0_i32_0 = arith.constant 0 : i32
    %c0_i32_1 = arith.constant 0 : i32
    return %c0_i32, %c0_i32_0 : i32, i32
  }
  func.func @transform_10(%arg0: i32) -> (i32, i32) {
    %c0_i32 = arith.constant 0 : i32
    %c0_i32_0 = arith.constant 0 : i32
    %c0_i32_1 = arith.constant 0 : i32
    return %c0_i32, %c0_i32_0 : i32, i32
  }
  func.func @transform_11(%arg0: i32) -> (i32, i32) {
    %c0_i32 = arith.constant 0 : i32
    %c0_i32_0 = arith.constant 0 : i32
    %c0_i32_1 = arith.constant 0 : i32
    return %c0_i32, %c0_i32_0 : i32, i32
  }
  func.func @transform_12(%arg0: i32) -> (i32, i32) {
    %c0_i32 = arith.constant 0 : i32
    %c0_i32_0 = arith.constant 0 : i32
    %c0_i32_1 = arith.constant 0 : i32
    return %c0_i32, %c0_i32_0 : i32, i32
  }
  func.func @transform_13(%arg0: i32) -> (i32, i32) {
    %c0_i32 = arith.constant 0 : i32
    %c0_i32_0 = arith.constant 0 : i32
    return %arg0, %c0_i32 : i32, i32
  }
}

module attributes {stable_mosaic.version = 11 : i64} {
  func.func @_mlp_kernel(%arg0: i32, %arg1: memref<2x1024xf32, #tpu.memory_space<vmem>>, %arg2: memref<1024x128xbf16, #tpu.memory_space<vmem>>, %arg3: memref<1x128xf32, #tpu.memory_space<vmem>>, %arg4: memref<128x128xbf16, #tpu.memory_space<vmem>>, %arg5: memref<1x128xf32, #tpu.memory_space<vmem>>, %arg6: memref<128x128xbf16, #tpu.memory_space<vmem>>, %arg7: memref<1x128xf32, #tpu.memory_space<vmem>>, %arg8: memref<128x128xbf16, #tpu.memory_space<vmem>>, %arg9: memref<1x128xf32, #tpu.memory_space<vmem>>, %arg10: memref<128x128xbf16, #tpu.memory_space<vmem>>, %arg11: memref<1x128xf32, #tpu.memory_space<vmem>>, %arg12: memref<128x128xbf16, #tpu.memory_space<vmem>>, %arg13: memref<1x128xf32, #tpu.memory_space<vmem>>, %arg14: memref<2x128xf32, #tpu.memory_space<vmem>>) attributes {dimension_semantics = [#tpu.dimension_semantics<parallel>], iteration_bounds = array<i64: 1>, scalar_prefetch = 0 : i64, scratch_operands = 0 : i64, tpu.core_type = #tpu.core_type<tc>, window_params = [{transform_indices = @transform_0, window_bounds = array<i64: 2, 1024>}, {pipeline_mode = #tpu.pipeline_mode<synchronous>, transform_indices = @transform_1, window_bounds = array<i64: 1024, 128>}, {pipeline_mode = #tpu.pipeline_mode<synchronous>, transform_indices = @transform_2, window_bounds = array<i64: 1, 128>}, {pipeline_mode = #tpu.pipeline_mode<synchronous>, transform_indices = @transform_3, window_bounds = array<i64: 128, 128>}, {pipeline_mode = #tpu.pipeline_mode<synchronous>, transform_indices = @transform_4, window_bounds = array<i64: 1, 128>}, {pipeline_mode = #tpu.pipeline_mode<synchronous>, transform_indices = @transform_5, window_bounds = array<i64: 128, 128>}, {pipeline_mode = #tpu.pipeline_mode<synchronous>, transform_indices = @transform_6, window_bounds = array<i64: 1, 128>}, {pipeline_mode = #tpu.pipeline_mode<synchronous>, transform_indices = @transform_7, window_bounds = array<i64: 128, 128>}, {pipeline_mode = #tpu.pipeline_mode<synchronous>, transform_indices = @transform_8, window_bounds = array<i64: 1, 128>}, {pipeline_mode = #tpu.pipeline_mode<synchronous>, transform_indices = @transform_9, window_bounds = array<i64: 128, 128>}, {pipeline_mode = #tpu.pipeline_mode<synchronous>, transform_indices = @transform_10, window_bounds = array<i64: 1, 128>}, {pipeline_mode = #tpu.pipeline_mode<synchronous>, transform_indices = @transform_11, window_bounds = array<i64: 128, 128>}, {pipeline_mode = #tpu.pipeline_mode<synchronous>, transform_indices = @transform_12, window_bounds = array<i64: 1, 128>}, {transform_indices = @transform_13, window_bounds = array<i64: 2, 128>}]} {
    %c0 = arith.constant 0 : index
    %c0_0 = arith.constant 0 : index
    %0 = vector.load %arg1[%c0, %c0_0] : memref<2x1024xf32, #tpu.memory_space<vmem>>, vector<2x1024xf32>
    %1 = arith.truncf %0 : vector<2x1024xf32> to vector<2x1024xbf16>
    %c0_1 = arith.constant 0 : index
    %c0_2 = arith.constant 0 : index
    %2 = vector.load %arg2[%c0_1, %c0_2] : memref<1024x128xbf16, #tpu.memory_space<vmem>>, vector<1024x128xbf16>
    %cst = arith.constant dense<0.000000e+00> : vector<2x128xf32>
    %3 = tpu.matmul %1, %2, %cst {dimension_numbers = #tpu.dot_dimension_numbers<[1], [0], [0], [1], [0, 0, 1, 1], [], []>} : vector<2x1024xbf16>, vector<1024x128xbf16>, vector<2x128xf32> -> vector<2x128xf32>
    %c0_3 = arith.constant 0 : index
    %c0_4 = arith.constant 0 : index
    %4 = vector.load %arg3[%c0_3, %c0_4] : memref<1x128xf32, #tpu.memory_space<vmem>>, vector<1x128xf32>
    %5 = vector.broadcast %4 : vector<1x128xf32> to vector<2x128xf32>
    %6 = arith.addf %3, %5 : vector<2x128xf32>
    %7 = arith.negf %6 : vector<2x128xf32>
    %8 = math.exp %7 : vector<2x128xf32>
    %cst_5 = arith.constant 1.000000e+00 : f32
    %9 = vector.broadcast %cst_5 : f32 to vector<2x128xf32>
    %10 = arith.addf %9, %8 : vector<2x128xf32>
    %11 = arith.divf %9, %10 : vector<2x128xf32>
    %12 = arith.truncf %11 : vector<2x128xf32> to vector<2x128xbf16>
    %c0_6 = arith.constant 0 : index
    %c0_7 = arith.constant 0 : index
    %13 = vector.load %arg4[%c0_6, %c0_7] : memref<128x128xbf16, #tpu.memory_space<vmem>>, vector<128x128xbf16>
    %cst_8 = arith.constant dense<0.000000e+00> : vector<2x128xf32>
    %14 = tpu.matmul %12, %13, %cst_8 {dimension_numbers = #tpu.dot_dimension_numbers<[1], [0], [0], [1], [0, 0, 1, 1], [], []>} : vector<2x128xbf16>, vector<128x128xbf16>, vector<2x128xf32> -> vector<2x128xf32>
    %c0_9 = arith.constant 0 : index
    %c0_10 = arith.constant 0 : index
    %15 = vector.load %arg5[%c0_9, %c0_10] : memref<1x128xf32, #tpu.memory_space<vmem>>, vector<1x128xf32>
    %16 = vector.broadcast %15 : vector<1x128xf32> to vector<2x128xf32>
    %17 = arith.addf %14, %16 : vector<2x128xf32>
    %18 = arith.negf %17 : vector<2x128xf32>
    %19 = math.exp %18 : vector<2x128xf32>
    %cst_11 = arith.constant 1.000000e+00 : f32
    %20 = vector.broadcast %cst_11 : f32 to vector<2x128xf32>
    %21 = arith.addf %20, %19 : vector<2x128xf32>
    %22 = arith.divf %20, %21 : vector<2x128xf32>
    %23 = arith.truncf %22 : vector<2x128xf32> to vector<2x128xbf16>
    %c0_12 = arith.constant 0 : index
    %c0_13 = arith.constant 0 : index
    %24 = vector.load %arg6[%c0_12, %c0_13] : memref<128x128xbf16, #tpu.memory_space<vmem>>, vector<128x128xbf16>
    %cst_14 = arith.constant dense<0.000000e+00> : vector<2x128xf32>
    %25 = tpu.matmul %23, %24, %cst_14 {dimension_numbers = #tpu.dot_dimension_numbers<[1], [0], [0], [1], [0, 0, 1, 1], [], []>} : vector<2x128xbf16>, vector<128x128xbf16>, vector<2x128xf32> -> vector<2x128xf32>
    %c0_15 = arith.constant 0 : index
    %c0_16 = arith.constant 0 : index
    %26 = vector.load %arg7[%c0_15, %c0_16] : memref<1x128xf32, #tpu.memory_space<vmem>>, vector<1x128xf32>
    %27 = vector.broadcast %26 : vector<1x128xf32> to vector<2x128xf32>
    %28 = arith.addf %25, %27 : vector<2x128xf32>
    %29 = arith.negf %28 : vector<2x128xf32>
    %30 = math.exp %29 : vector<2x128xf32>
    %cst_17 = arith.constant 1.000000e+00 : f32
    %31 = vector.broadcast %cst_17 : f32 to vector<2x128xf32>
    %32 = arith.addf %31, %30 : vector<2x128xf32>
    %33 = arith.divf %31, %32 : vector<2x128xf32>
    %34 = arith.truncf %33 : vector<2x128xf32> to vector<2x128xbf16>
    %c0_18 = arith.constant 0 : index
    %c0_19 = arith.constant 0 : index
    %35 = vector.load %arg8[%c0_18, %c0_19] : memref<128x128xbf16, #tpu.memory_space<vmem>>, vector<128x128xbf16>
    %cst_20 = arith.constant dense<0.000000e+00> : vector<2x128xf32>
    %36 = tpu.matmul %34, %35, %cst_20 {dimension_numbers = #tpu.dot_dimension_numbers<[1], [0], [0], [1], [0, 0, 1, 1], [], []>} : vector<2x128xbf16>, vector<128x128xbf16>, vector<2x128xf32> -> vector<2x128xf32>
    %c0_21 = arith.constant 0 : index
    %c0_22 = arith.constant 0 : index
    %37 = vector.load %arg9[%c0_21, %c0_22] : memref<1x128xf32, #tpu.memory_space<vmem>>, vector<1x128xf32>
    %38 = vector.broadcast %37 : vector<1x128xf32> to vector<2x128xf32>
    %39 = arith.addf %36, %38 : vector<2x128xf32>
    %40 = arith.negf %39 : vector<2x128xf32>
    %41 = math.exp %40 : vector<2x128xf32>
    %cst_23 = arith.constant 1.000000e+00 : f32
    %42 = vector.broadcast %cst_23 : f32 to vector<2x128xf32>
    %43 = arith.addf %42, %41 : vector<2x128xf32>
    %44 = arith.divf %42, %43 : vector<2x128xf32>
    %45 = arith.truncf %44 : vector<2x128xf32> to vector<2x128xbf16>
    %c0_24 = arith.constant 0 : index
    %c0_25 = arith.constant 0 : index
    %46 = vector.load %arg10[%c0_24, %c0_25] : memref<128x128xbf16, #tpu.memory_space<vmem>>, vector<128x128xbf16>
    %cst_26 = arith.constant dense<0.000000e+00> : vector<2x128xf32>
    %47 = tpu.matmul %45, %46, %cst_26 {dimension_numbers = #tpu.dot_dimension_numbers<[1], [0], [0], [1], [0, 0, 1, 1], [], []>} : vector<2x128xbf16>, vector<128x128xbf16>, vector<2x128xf32> -> vector<2x128xf32>
    %c0_27 = arith.constant 0 : index
    %c0_28 = arith.constant 0 : index
    %48 = vector.load %arg11[%c0_27, %c0_28] : memref<1x128xf32, #tpu.memory_space<vmem>>, vector<1x128xf32>
    %49 = vector.broadcast %48 : vector<1x128xf32> to vector<2x128xf32>
    %50 = arith.addf %47, %49 : vector<2x128xf32>
    %51 = arith.negf %50 : vector<2x128xf32>
    %52 = math.exp %51 : vector<2x128xf32>
    %cst_29 = arith.constant 1.000000e+00 : f32
    %53 = vector.broadcast %cst_29 : f32 to vector<2x128xf32>
    %54 = arith.addf %53, %52 : vector<2x128xf32>
    %55 = arith.divf %53, %54 : vector<2x128xf32>
    %56 = arith.truncf %55 : vector<2x128xf32> to vector<2x128xbf16>
    %c0_30 = arith.constant 0 : index
    %c0_31 = arith.constant 0 : index
    %57 = vector.load %arg12[%c0_30, %c0_31] : memref<128x128xbf16, #tpu.memory_space<vmem>>, vector<128x128xbf16>
    %cst_32 = arith.constant dense<0.000000e+00> : vector<2x128xf32>
    %58 = tpu.matmul %56, %57, %cst_32 {dimension_numbers = #tpu.dot_dimension_numbers<[1], [0], [0], [1], [0, 0, 1, 1], [], []>} : vector<2x128xbf16>, vector<128x128xbf16>, vector<2x128xf32> -> vector<2x128xf32>
    %c0_33 = arith.constant 0 : index
    %c0_34 = arith.constant 0 : index
    %59 = vector.load %arg13[%c0_33, %c0_34] : memref<1x128xf32, #tpu.memory_space<vmem>>, vector<1x128xf32>
    %60 = vector.broadcast %59 : vector<1x128xf32> to vector<2x128xf32>
    %61 = arith.addf %58, %60 : vector<2x128xf32>
    %cst_35 = arith.constant dense<0xFF800000> : vector<2xf32>
    %62 = vector.multi_reduction <maximumf>, %61, %cst_35 [1] : vector<2x128xf32> to vector<2xf32>
    %63 = vector.shape_cast %62 : vector<2xf32> to vector<2x1xf32>
    %64 = vector.broadcast %63 : vector<2x1xf32> to vector<2x128xf32>
    %65 = arith.subf %61, %64 : vector<2x128xf32>
    %66 = math.exp %65 : vector<2x128xf32>
    %cst_36 = arith.constant dense<0.000000e+00> : vector<2xf32>
    %67 = vector.multi_reduction <add>, %66, %cst_36 [1] : vector<2x128xf32> to vector<2xf32>
    %68 = vector.shape_cast %67 : vector<2xf32> to vector<2x1xf32>
    %69 = math.log %68 : vector<2x1xf32>
    %70 = vector.broadcast %69 : vector<2x1xf32> to vector<2x128xf32>
    %71 = arith.subf %65, %70 : vector<2x128xf32>
    %c0_37 = arith.constant 0 : index
    %c0_38 = arith.constant 0 : index
    %72 = vector.load %arg14[%c0_37, %c0_38] : memref<2x128xf32, #tpu.memory_space<vmem>>, vector<2x128xf32>
    tpu.vector_store %arg14[%c0_37, %c0_38], %71 {strides = array<i32>} : memref<2x128xf32, #tpu.memory_space<vmem>>, vector<2x128xf32>,
    return
  }
  func.func @transform_0(%arg0: i32) -> (i32, i32) {
    %c0_i32 = arith.constant 0 : i32
    %c0_i32_0 = arith.constant 0 : i32
    return %arg0, %c0_i32 : i32, i32
  }
  func.func @transform_1(%arg0: i32) -> (i32, i32) {
    %c0_i32 = arith.constant 0 : i32
    %c0_i32_0 = arith.constant 0 : i32
    %c0_i32_1 = arith.constant 0 : i32
    return %c0_i32, %c0_i32_0 : i32, i32
  }
  func.func @transform_2(%arg0: i32) -> (i32, i32) {
    %c0_i32 = arith.constant 0 : i32
    %c0_i32_0 = arith.constant 0 : i32
    %c0_i32_1 = arith.constant 0 : i32
    return %c0_i32, %c0_i32_0 : i32, i32
  }
  func.func @transform_3(%arg0: i32) -> (i32, i32) {
    %c0_i32 = arith.constant 0 : i32
    %c0_i32_0 = arith.constant 0 : i32
    %c0_i32_1 = arith.constant 0 : i32
    return %c0_i32, %c0_i32_0 : i32, i32
  }
  func.func @transform_4(%arg0: i32) -> (i32, i32) {
    %c0_i32 = arith.constant 0 : i32
    %c0_i32_0 = arith.constant 0 : i32
    %c0_i32_1 = arith.constant 0 : i32
    return %c0_i32, %c0_i32_0 : i32, i32
  }
  func.func @transform_5(%arg0: i32) -> (i32, i32) {
    %c0_i32 = arith.constant 0 : i32
    %c0_i32_0 = arith.constant 0 : i32
    %c0_i32_1 = arith.constant 0 : i32
    return %c0_i32, %c0_i32_0 : i32, i32
  }
  func.func @transform_6(%arg0: i32) -> (i32, i32) {
    %c0_i32 = arith.constant 0 : i32
    %c0_i32_0 = arith.constant 0 : i32
    %c0_i32_1 = arith.constant 0 : i32
    return %c0_i32, %c0_i32_0 : i32, i32
  }
  func.func @transform_7(%arg0: i32) -> (i32, i32) {
    %c0_i32 = arith.constant 0 : i32
    %c0_i32_0 = arith.constant 0 : i32
    %c0_i32_1 = arith.constant 0 : i32
    return %c0_i32, %c0_i32_0 : i32, i32
  }
  func.func @transform_8(%arg0: i32) -> (i32, i32) {
    %c0_i32 = arith.constant 0 : i32
    %c0_i32_0 = arith.constant 0 : i32
    %c0_i32_1 = arith.constant 0 : i32
    return %c0_i32, %c0_i32_0 : i32, i32
  }
  func.func @transform_9(%arg0: i32) -> (i32, i32) {
    %c0_i32 = arith.constant 0 : i32
    %c0_i32_0 = arith.constant 0 : i32
    %c0_i32_1 = arith.constant 0 : i32
    return %c0_i32, %c0_i32_0 : i32, i32
  }
  func.func @transform_10(%arg0: i32) -> (i32, i32) {
    %c0_i32 = arith.constant 0 : i32
    %c0_i32_0 = arith.constant 0 : i32
    %c0_i32_1 = arith.constant 0 : i32
    return %c0_i32, %c0_i32_0 : i32, i32
  }
  func.func @transform_11(%arg0: i32) -> (i32, i32) {
    %c0_i32 = arith.constant 0 : i32
    %c0_i32_0 = arith.constant 0 : i32
    %c0_i32_1 = arith.constant 0 : i32
    return %c0_i32, %c0_i32_0 : i32, i32
  }
  func.func @transform_12(%arg0: i32) -> (i32, i32) {
    %c0_i32 = arith.constant 0 : i32
    %c0_i32_0 = arith.constant 0 : i32
    %c0_i32_1 = arith.constant 0 : i32
    return %c0_i32, %c0_i32_0 : i32, i32
  }
  func.func @transform_13(%arg0: i32) -> (i32, i32) {
    %c0_i32 = arith.constant 0 : i32
    %c0_i32_0 = arith.constant 0 : i32
    return %arg0, %c0_i32 : i32, i32
  }
}

</mosaic_0001>

<bundles_post_ra>
// kernel: tpu_custom_call.1
= control target key start
LH: loop header
LB: loop body
LE: loop exit
PB: predicated region body
PF: predicated region fallthrough
CT: control target
= control target key end

     0   :  { %18 = vsyncpa [#allocation3], 0  ;;  %s2249_s0 = inlined_call_operand.hbm [shape: f32[2,1024], index: 0, kind: input, shape index: {}]   ;;  %s2250_s1 = inlined_call_operand.hbm [shape: bf16[1024,128], index: 1, kind: input, shape index: {}]   ;;  %s2251_s2 = inlined_call_operand.vmem [shape: f32[1,128], index: 2, kind: input, shape index: {}]   ;;  %s2252_s3 = inlined_call_operand.hbm [shape: bf16[128,128], index: 3, kind: input, shape index: {}]   ;;  %s2253_s4 = inlined_call_operand.vmem [shape: f32[1,128], index: 4, kind: input, shape index: {}]   ;;  %s2254_s5 = inlined_call_operand.hbm [shape: bf16[128,128], index: 5, kind: input, shape index: {}]   ;;  %s2255_s6 = inlined_call_operand.vmem [shape: f32[1,128], index: 6, kind: input, shape index: {}]   ;;  %s2256_s7 = inlined_call_operand.hbm [shape: bf16[128,128], index: 7, kind: input, shape index: {}]   ;;  %s2257_s8 = inlined_call_operand.vmem [shape: f32[1,128], index: 8, kind: input, shape index: {}]   ;;  %s2258_s9 = inlined_call_operand.hbm [shape: bf16[128,128], index: 9, kind: input, shape index: {}]   ;;  %s2259_s10 = inlined_call_operand.vmem [shape: f32[1,128], index: 10, kind: input, shape index: {}]   ;;  %s2260_s11 = inlined_call_operand.hbm [shape: bf16[128,128], index: 11, kind: input, shape index: {}]   ;;  %s2261_s12 = inlined_call_operand.vmem [shape: f32[1,128], index: 12, kind: input, shape index: {}]   ;;  %s2262_s13 = inlined_call_operand.hbm [shape: f32[2,128], index: 13, kind: output, shape index: {}]  }
   0x1   :  { %19 = vsyncpa [#allocation6], 0 }
   0x2   :  { %20 = vsyncpa [#allocation9], 0 }
   0x3   :  { %21 = vsyncpa [#allocation12], 0  ;;  %s38_s27 = sshll.u32 %s2250_s1, 4  ;;  %s39_s27 = int_to_ptr.hbm [resolvable:$true] %s38_s27 }
   0x4   :  { %22 = vsyncpa [#allocation4], 0  ;;  %s2109_s28 = smov [#allocation5]   ;;  %s68_s15 = sshll.u32 %s2254_s5, 4  ;;  %s69_s15 = int_to_ptr.hbm [resolvable:$true] %s68_s15 }
   0x5   :  { %s40_s29 = sshll.u32 %s2109_s28, 4  ;;  %s2110_s16 = smov 64   ;;  %s41_s29 = int_to_ptr.vmem [resolvable:$true] %s40_s29 }
   0x6   :  { %s2111_s17 = smov 4   ;;  %s2112_s18 = smov [#allocation8]  }
   0x7   :  { %46 = dma.hbm_to_vmem [thread:$0]  %s39_s27, 8192, %s41_s29, [#allocation6], %s2110_s16, %s2110_s16, %s2111_s17  }
   0x8   :  { %s70_s19 = sshll.u32 %s2112_s18, 4  ;;  %s98_s21 = sshll.u32 %s2258_s9, 4  ;;  %s71_s19 = int_to_ptr.vmem [resolvable:$true] %s70_s19  ;;  %s99_s21 = int_to_ptr.hbm [resolvable:$true] %s98_s21 }
   0x9   :  { %76 = dma.hbm_to_vmem [thread:$0]  %s69_s15, 1024, %s71_s19, [#allocation9], %s2110_s16, %s2110_s16, %s2111_s17  }
   0xa   :  { %s28_s23 = sshll.u32 %s2249_s0, 4  ;;  %s2113_s24 = smov [#allocation11]   ;;  %s29_s23 = int_to_ptr.hbm [resolvable:$true] %s28_s23 }
   0xb   :  { %s100_s25 = sshll.u32 %s2113_s24, 4  ;;  %s2114_s26 = smov [#allocation2]   ;;  %s101_s25 = int_to_ptr.vmem [resolvable:$true] %s100_s25 }
   0xc   :  { %106 = dma.hbm_to_vmem [thread:$0]  %s99_s21, 1024, %s101_s25, [#allocation12], %s2110_s16, %s2110_s16, %s2111_s17  }
   0xd   :  { %s30_s9 = sshll.u32 %s2114_s26, 4  ;;  %s53_s29 = sshll.u32 %s2252_s3, 4  ;;  %s31_s9 = int_to_ptr.vmem [resolvable:$true] %s30_s9  ;;  %s54_s29 = int_to_ptr.hbm [resolvable:$true] %s53_s29 }
   0xe   :  { %33 = dma.hbm_to_vmem [thread:$0]  %s29_s23, 256, %s31_s9, [#allocation3]  }
   0xf   :  { %s83_s0 = sshll.u32 %s2256_s7, 4  ;;  %s2115_s15 = smov [#allocation7]   ;;  %s84_s0 = int_to_ptr.hbm [resolvable:$true] %s83_s0 }
  0x10   :  { %s55_s18 = sshll.u32 %s2115_s15, 4  ;;  %s2116_s19 = smov [#allocation10]   ;;  %s56_s18 = int_to_ptr.vmem [resolvable:$true] %s55_s18 }
  0x11   :  { %61 = dma.hbm_to_vmem [thread:$0]  %s54_s29, 1024, %s56_s18, [#allocation6], %s2110_s16, %s2110_s16, %s2111_s17  }
  0x12   :  { %s85_s20 = sshll.u32 %s2116_s19, 4  ;;  %s113_s3 = sshll.u32 %s2260_s11, 4  ;;  %s86_s20 = int_to_ptr.vmem [resolvable:$true] %s85_s20  ;;  %s114_s3 = int_to_ptr.hbm [resolvable:$true] %s113_s3 }
  0x13   :  { %91 = dma.hbm_to_vmem [thread:$0]  %s84_s0, 1024, %s86_s20, [#allocation9], %s2110_s16, %s2110_s16, %s2111_s17  }
  0x14   :  { %s2117_s7 = smov [#allocation13]  }
  0x15   :  { %s115_s5 = sshll.u32 %s2117_s7, 4  ;;  %s116_s5 = int_to_ptr.vmem [resolvable:$true] %s115_s5 }
  0x16   :  { %121 = dma.hbm_to_vmem [thread:$0]  %s114_s3, 1024, %s116_s5, [#allocation12], %s2110_s16, %s2110_s16, %s2111_s17  }
  0x17   :  { %2099 = dma.done.wait [#allocation3], 256  }
  0x18   :  { %2100 = vsyncadd [#allocation3], 4294967040 }
  0x19   :  { %2101 = dma.done.wait [#allocation6], 9216  }
  0x1a   :  { %2102 = vsyncadd [#allocation6], 4294958080 }
  0x1b   :  { %2103 = dma.done.wait [#allocation9], 2048  }
  0x1c   :  { %2104 = vsyncadd [#allocation9], 4294965248 }
  0x1d   :  { %2105 = dma.done.wait [#allocation12], 2048  }
  0x1e   :  { %2106 = vsyncadd [#allocation12], 4294965248  ;;  %v1770_v0 = vld [vmem:[#allocation5 + $0x38] sm:$0xff]  ;;  %v1769_v4 = vld [vmem:[#allocation5 + $0x30] sm:$0xff]  ;;  %s2118_s26 = smov [#allocation14]   ;;  %s1329_s28 = sshll.u32 %s2262_s13, 4  ;;  %s1330_s28 = int_to_ptr.hbm [resolvable:$true] %s1329_s28 }
  0x1f   :  { %v1778_v1 = vld [vmem:[#allocation5 + $0x78] sm:$0xff]  ;;  %699 = vmatpush.bf16.msra.mxu0 %v1770_v0  ;;  %v1777_v5 = vld [vmem:[#allocation5 + $0x70] sm:$0xff]  ;;  %v1768_v8 = vld [vmem:[#allocation5 + $0x28] sm:$0xff]  ;;  %s1327_s9 = sshll.u32 %s2118_s26, 4  ;;  %s1328_s9 = int_to_ptr.vmem [resolvable:$true] %s1327_s9 }
  0x20   :  { %v1786_v2 = vld [vmem:[#allocation5 + $0xb8] sm:$0xff]  ;;  %712 = vmatpush.bf16.msra.mxu1 %v1778_v1  ;;  %v1785_v6 = vld [vmem:[#allocation5 + $0xb0] sm:$0xff]  ;;  %v1776_v9 = vld [vmem:[#allocation5 + $0x68] sm:$0xff] }
  0x21   :  { %v1794_v3 = vld [vmem:[#allocation5 + $0xf8] sm:$0xff]  ;;  %725 = vmatpush.bf16.msra.mxu2 %v1786_v2  ;;  %v1793_v7 = vld [vmem:[#allocation5 + $0xf0] sm:$0xff]  ;;  %v1784_v10 = vld [vmem:[#allocation5 + $0xa8] sm:$0xff] }
  0x22   :  { %738 = vmatpush.bf16.msra.mxu3 %v1794_v3  ;;  %v1792_v11 = vld [vmem:[#allocation5 + $0xe8] sm:$0xff]  ;;  %v1767_v12 = vld [vmem:[#allocation5 + $0x20] sm:$0xff]  ;;  %v152_v16 = vld [vmem:[#allocation2] sm:$0xff] }
  0x23   :  { %700 = vmatpush.bf16.msra.mxu0 %v1769_v4  ;;  %v1775_v13 = vld [vmem:[#allocation5 + $0x60] sm:$0xff]  ;;  %v1766_v17 = vld [vmem:[#allocation5 + $0x18] sm:$0xff]  ;;  %156 = vst [vmem:[#allocation1] ss:$4 sm:$0xff] %v152_v16  ;;  %v1765_v21 = vld [vmem:[#allocation5 + $0x10] sm:$0xff] }
  0x24   :  { %713 = vmatpush.bf16.msra.mxu1 %v1777_v5  ;;  %v1783_v14 = vld [vmem:[#allocation5 + $0xa0] sm:$0xff]  ;;  %v1774_v18 = vld [vmem:[#allocation5 + $0x58] sm:$0xff]  ;;  %v1773_v22 = vld [vmem:[#allocation5 + $0x50] sm:$0xff] }
  0x25   :  { %726 = vmatpush.bf16.msra.mxu2 %v1785_v6  ;;  %v1791_v15 = vld [vmem:[#allocation5 + $0xe0] sm:$0xff]  ;;  %v1782_v19 = vld [vmem:[#allocation5 + $0x98] sm:$0xff]  ;;  %v1781_v23 = vld [vmem:[#allocation5 + $0x90] sm:$0xff] }
  0x26   :  { %739 = vmatpush.bf16.msra.mxu3 %v1793_v7  ;;  %v1790_v20 = vld [vmem:[#allocation5 + $0xd8] sm:$0xff]  ;;  %v1789_v24 = vld [vmem:[#allocation5 + $0xd0] sm:$0xff]  ;;  %v1764_v25 = vld [vmem:[#allocation5 + $0x8] sm:$0xff] }
  0x27   :  { %701 = vmatpush.bf16.msra.mxu0 %v1768_v8  ;;  %v1772_v26 = vld [vmem:[#allocation5 + $0x48] sm:$0xff]  ;;  %v153_v29 = vld [vmem:[#allocation2 + $0x8] sm:$0xff]  ;;  %v1763_v30 = vld [vmem:[#allocation5] sm:$0xff] }
  0x28   :  { %714 = vmatpush.bf16.msra.mxu1 %v1776_v9  ;;  %v1780_v27 = vld [vmem:[#allocation5 + $0x88] sm:$0xff]  ;;  %v1771_v31 = vld [vmem:[#allocation5 + $0x40] sm:$0xff]  ;;  %158 = vst [vmem:[#allocation1 + $0x20] ss:$4 sm:$0xff] %v153_v29  ;;  %v1802_v34 = vld [vmem:[#allocation5 + $0x138] sm:$0xff] }
  0x29   :  { %727 = vmatpush.bf16.msra.mxu2 %v1784_v10  ;;  %v1788_v28 = vld [vmem:[#allocation5 + $0xc8] sm:$0xff]  ;;  %v1779_v32 = vld [vmem:[#allocation5 + $0x80] sm:$0xff]  ;;  %v1810_v35 = vld [vmem:[#allocation5 + $0x178] sm:$0xff] }
  0x2a   :  { %740 = vmatpush.bf16.msra.mxu3 %v1792_v11  ;;  %v1787_v33 = vld [vmem:[#allocation5 + $0xc0] sm:$0xff]  ;;  %v161_v36 = vld.sshfl [vmem:[#allocation1 + $0x10] sm:$0xff pattern:$0x73625140]  ;;  %v1801_v46 = vld [vmem:[#allocation5 + $0x130] sm:$0xff] }
  0x2b   :  { %702 = vmatpush.bf16.msra.mxu0 %v1767_v12  ;;  %v159_v37 = vld.sshfl [vmem:[#allocation1] sm:$0xff pattern:$0x73625140]  ;;  %v162_v38 = vld.sshfl [vmem:[#allocation1 + $0x18] sm:$0xff pattern:$0x73625140]  ;;  %v177_v42 = vpack.c.bf16 %v161_v36, %v161_v36 }
  0x2c   :  { %715 = vmatpush.bf16.msra.mxu1 %v1775_v13  ;;  %v160_v39 = vld.sshfl [vmem:[#allocation1 + $0x8] sm:$0xff pattern:$0x73625140]  ;;  %v1818_v40 = vld [vmem:[#allocation5 + $0x1b8] sm:$0xff]  ;;  %v175_v43 = vpack.c.bf16 %v159_v37, %v159_v37  ;;  %v178_v44 = vpack.c.bf16 %v162_v38, %v162_v38  ;;  %v1800_v50 = vld [vmem:[#allocation5 + $0x128] sm:$0xff] }
  0x2d   :  { %728 = vmatpush.bf16.msra.mxu2 %v1783_v14  ;;  %v1826_v41 = vld [vmem:[#allocation5 + $0x1f8] sm:$0xff]  ;;  %v176_v45 = vpack.c.bf16 %v160_v39, %v160_v39  ;;  %v1809_v47 = vld [vmem:[#allocation5 + $0x170] sm:$0xff]  ;;  %v1808_v51 = vld [vmem:[#allocation5 + $0x168] sm:$0xff] }
  0x2e   :  { %741 = vmatpush.bf16.msra.mxu3 %v1791_v15  ;;  %v1817_v48 = vld [vmem:[#allocation5 + $0x1b0] sm:$0xff]  ;;  %v1816_v52 = vld [vmem:[#allocation5 + $0x1a8] sm:$0xff]  ;;  %v1799_v54 = vld [vmem:[#allocation5 + $0x120] sm:$0xff] }
  0x2f   :  { %703 = vmatpush.bf16.msra.mxu0 %v1766_v17  ;;  %v1825_v49 = vld [vmem:[#allocation5 + $0x1f0] sm:$0xff]  ;;  %v1824_v53 = vld [vmem:[#allocation5 + $0x1e8] sm:$0xff]  ;;  %v1807_v55 = vld [vmem:[#allocation5 + $0x160] sm:$0xff] }
  0x30   :  { %716 = vmatpush.bf16.msra.mxu1 %v1774_v18  ;;  %v1815_v56 = vld [vmem:[#allocation5 + $0x1a0] sm:$0xff]  ;;  %v1798_v58 = vld [vmem:[#allocation5 + $0x118] sm:$0xff]  ;;  %v1797_v62 = vld [vmem:[#allocation5 + $0x110] sm:$0xff] }
  0x31   :  { %729 = vmatpush.bf16.msra.mxu2 %v1782_v19  ;;  %v1823_v57 = vld [vmem:[#allocation5 + $0x1e0] sm:$0xff]  ;;  %v1806_v59 = vld [vmem:[#allocation5 + $0x158] sm:$0xff]  ;;  %v1805_v63 = vld [vmem:[#allocation5 + $0x150] sm:$0xff] }
  0x32   :  { %742 = vmatpush.bf16.msra.mxu3 %v1790_v20  ;;  %v1814_v60 = vld [vmem:[#allocation5 + $0x198] sm:$0xff]  ;;  %v1813_v0 = vld [vmem:[#allocation5 + $0x190] sm:$0xff]  ;;  %v1796_v2 = vld [vmem:[#allocation5 + $0x108] sm:$0xff] }
  0x33   :  { %704 = vmatpush.bf16.msra.mxu0 %v1765_v21  ;;  %v1822_v61 = vld [vmem:[#allocation5 + $0x1d8] sm:$0xff]  ;;  %v1821_v1 = vld [vmem:[#allocation5 + $0x1d0] sm:$0xff]  ;;  %v1804_v3 = vld [vmem:[#allocation5 + $0x148] sm:$0xff] }
  0x34   :  { %717 = vmatpush.bf16.msra.mxu1 %v1773_v22  ;;  %v1812_v4 = vld [vmem:[#allocation5 + $0x188] sm:$0xff]  ;;  %v1795_v6 = vld [vmem:[#allocation5 + $0x100] sm:$0xff]  ;;  %v164_v11 = vld.sshfl [vmem:[#allocation1 + $0x28] sm:$0xff pattern:$0x73625140] }
  0x35   :  { %730 = vmatpush.bf16.msra.mxu2 %v1781_v23  ;;  %v1820_v5 = vld [vmem:[#allocation5 + $0x1c8] sm:$0xff]  ;;  %v1803_v7 = vld [vmem:[#allocation5 + $0x140] sm:$0xff]  ;;  %v165_v12 = vld.sshfl [vmem:[#allocation1 + $0x30] sm:$0xff pattern:$0x73625140]  ;;  %v180_v15 = vpack.c.bf16 %v164_v11, %v164_v11 }
  0x36   :  { %743 = vmatpush.bf16.msra.mxu3 %v1789_v24  ;;  %v1811_v8 = vld [vmem:[#allocation5 + $0x180] sm:$0xff]  ;;  %v163_v10 = vld.sshfl [vmem:[#allocation1 + $0x20] sm:$0xff pattern:$0x73625140]  ;;  %v181_v16 = vpack.c.bf16 %v165_v12, %v165_v12  ;;  %v1834_v21 = vld [vmem:[#allocation7 + $0x38] sm:$0xff] }
  0x37   :  { %705 = vmatpush.bf16.msra.mxu0 %v1764_v25  ;;  %v1819_v9 = vld [vmem:[#allocation5 + $0x1c0] sm:$0xff]  ;;  %v179_v14 = vpack.c.bf16 %v163_v10, %v163_v10  ;;  %v1833_v25 = vld [vmem:[#allocation7 + $0x30] sm:$0xff]  ;;  %v1828_v39 = vld [vmem:[#allocation7 + $0x8] sm:$0xff] }
  0x38   :  { %718 = vmatpush.bf16.msra.mxu1 %v1772_v26  ;;  %v166_v13 = vld.sshfl [vmem:[#allocation1 + $0x38] sm:$0xff pattern:$0x73625140]  ;;  %v1877_v26 = vld [vmem:[%s2251_s2] ss:$0 sm:$0xff] }
  0x39   :  { %731 = vmatpush.bf16.msra.mxu2 %v1780_v27  ;;  %v182_v17 = vpack.c.bf16 %v166_v13, %v166_v13 }
  0x3a   :  { %744 = vmatpush.bf16.msra.mxu3 %v1788_v28  ;;  %v1832_v28 = vld [vmem:[#allocation7 + $0x28] sm:$0xff] }
  0x3b   :  { %706 = vmatpush.bf16.msra.mxu0 %v1763_v30 }
  0x3c   :  { %719 = vmatpush.bf16.msra.mxu1 %v1771_v31  ;;  %v1831_v31 = vld [vmem:[#allocation7 + $0x20] sm:$0xff] }
  0x3d   :  { %732 = vmatpush.bf16.msra.mxu2 %v1779_v32 }
  0x3e   :  { %745 = vmatpush.bf16.msra.mxu3 %v1787_v33  ;;  %707 = vmatmul.bf16.vlgmr.msra.gmra.mxu0 %v175_v43  ;;  %v1830_v33 = vld [vmem:[#allocation7 + $0x18] sm:$0xff] }
  0x3f   :  { %751 = vmatpush.bf16.msrb.mxu0 %v1802_v34  ;;  %720 = vmatmul.bf16.vlgmr.msra.gmra.mxu1 %v176_v45 }
  0x40   :  { %764 = vmatpush.bf16.msrb.mxu1 %v1810_v35  ;;  %733 = vmatmul.bf16.vlgmr.msra.gmra.mxu2 %v177_v42  ;;  %v1829_v35 = vld [vmem:[#allocation7 + $0x10] sm:$0xff] }
  0x41   :  { %777 = vmatpush.bf16.msrb.mxu2 %v1818_v40  ;;  %746 = vmatmul.bf16.vlgmr.msra.gmra.mxu3 %v178_v44 }
  0x42   :  { %790 = vmatpush.bf16.msrb.mxu3 %v1826_v41  ;;  %v1827_v41 = vld [vmem:[#allocation7] sm:$0xff] }
  0x43   :  { %752 = vmatpush.bf16.msrb.mxu0 %v1801_v46 }
  0x44   :  { %765 = vmatpush.bf16.msrb.mxu1 %v1809_v47 }
  0x45   :  { %778 = vmatpush.bf16.msrb.mxu2 %v1817_v48 }
  0x46   :  { %791 = vmatpush.bf16.msrb.mxu3 %v1825_v49 }
  0x47   :  { %753 = vmatpush.bf16.msrb.mxu0 %v1800_v50 }
  0x48   :  { %766 = vmatpush.bf16.msrb.mxu1 %v1808_v51 }
  0x49   :  { %779 = vmatpush.bf16.msrb.mxu2 %v1816_v52 }
  0x4a   :  { %792 = vmatpush.bf16.msrb.mxu3 %v1824_v53 }
  0x4b   :  { %754 = vmatpush.bf16.msrb.mxu0 %v1799_v54 }
  0x4c   :  { %767 = vmatpush.bf16.msrb.mxu1 %v1807_v55 }
  0x4d   :  { %780 = vmatpush.bf16.msrb.mxu2 %v1815_v56 }
  0x4e   :  { %793 = vmatpush.bf16.msrb.mxu3 %v1823_v57 }
  0x4f   :  { %755 = vmatpush.bf16.msrb.mxu0 %v1798_v58 }
  0x50   :  { %768 = vmatpush.bf16.msrb.mxu1 %v1806_v59 }
  0x51   :  { %781 = vmatpush.bf16.msrb.mxu2 %v1814_v60 }
  0x52   :  { %794 = vmatpush.bf16.msrb.mxu3 %v1822_v61 }
  0x53   :  { %756 = vmatpush.bf16.msrb.mxu0 %v1797_v62 }
  0x54   :  { %769 = vmatpush.bf16.msrb.mxu1 %v1805_v63 }
  0x55   :  { %782 = vmatpush.bf16.msrb.mxu2 %v1813_v0 }
  0x56   :  { %795 = vmatpush.bf16.msrb.mxu3 %v1821_v1  ;;  %v1842_v1 = vld [vmem:[#allocation8 + $0x38] sm:$0xff] }
  0x57   :  { %757 = vmatpush.bf16.msrb.mxu0 %v1796_v2  ;;  %v1841_v2 = vld [vmem:[#allocation8 + $0x30] sm:$0xff] }
  0x58   :  { %770 = vmatpush.bf16.msrb.mxu1 %v1804_v3  ;;  %v1840_v3 = vld [vmem:[#allocation8 + $0x28] sm:$0xff] }
  0x59   :  { %783 = vmatpush.bf16.msrb.mxu2 %v1812_v4  ;;  %v1839_v4 = vld [vmem:[#allocation8 + $0x20] sm:$0xff] }
  0x5a   :  { %796 = vmatpush.bf16.msrb.mxu3 %v1820_v5  ;;  %v1838_v5 = vld [vmem:[#allocation8 + $0x18] sm:$0xff] }
  0x5b   :  { %758 = vmatpush.bf16.msrb.mxu0 %v1795_v6  ;;  %v1837_v6 = vld [vmem:[#allocation8 + $0x10] sm:$0xff] }
  0x5c   :  { %771 = vmatpush.bf16.msrb.mxu1 %v1803_v7  ;;  %v1836_v7 = vld [vmem:[#allocation8 + $0x8] sm:$0xff] }
  0x5d   :  { %784 = vmatpush.bf16.msrb.mxu2 %v1811_v8  ;;  %v1835_v8 = vld [vmem:[#allocation8] sm:$0xff] }
  0x5e   :  { %797 = vmatpush.bf16.msrb.mxu3 %v1819_v9  ;;  %759 = vmatmul.bf16.vlgmr.msrb.gmra.mxu0 %v179_v14  ;;  %v1878_v9 = vld [vmem:[%s2253_s4] ss:$0 sm:$0xff] }
  0x5f   :  { %772 = vmatmul.bf16.vlgmr.msrb.gmra.mxu1 %v180_v15  ;;  %891 = vmatpush.bf16.msra.mxu0 %v1834_v21 }
  0x60   :  { %785 = vmatmul.bf16.vlgmr.msrb.gmra.mxu2 %v181_v16  ;;  %992 = vmatpush.bf16.msra.mxu1 %v1842_v1 }
  0x61   :  { %798 = vmatmul.bf16.vlgmr.msrb.gmra.mxu3 %v182_v17 }
  0x63   :  { %892 = vmatpush.bf16.msra.mxu0 %v1833_v25 }
  0x64   :  { %993 = vmatpush.bf16.msra.mxu1 %v1841_v2 }
  0x67   :  { %893 = vmatpush.bf16.msra.mxu0 %v1832_v28  ;;  %v1849_v28 = vld [vmem:[#allocation10 + $0x30] sm:$0xff] }
  0x68   :  { %994 = vmatpush.bf16.msra.mxu1 %v1840_v3 }
  0x6b   :  { %894 = vmatpush.bf16.msra.mxu0 %v1831_v31  ;;  %v1846_v31 = vld [vmem:[#allocation10 + $0x18] sm:$0xff] }
  0x6c   :  { %995 = vmatpush.bf16.msra.mxu1 %v1839_v4 }
  0x6f   :  { %895 = vmatpush.bf16.msra.mxu0 %v1830_v33  ;;  %v1844_v33 = vld [vmem:[#allocation10 + $0x8] sm:$0xff] }
  0x70   :  { %996 = vmatpush.bf16.msra.mxu1 %v1838_v5 }
  0x73   :  { %896 = vmatpush.bf16.msra.mxu0 %v1829_v35  ;;  %v1879_v35 = vld [vmem:[%s2255_s6] ss:$0 sm:$0xff] }
  0x74   :  { %997 = vmatpush.bf16.msra.mxu1 %v1837_v6 }
  0x77   :  { %897 = vmatpush.bf16.msra.mxu0 %v1828_v39 }
  0x78   :  { %998 = vmatpush.bf16.msra.mxu1 %v1836_v7 }
  0x7b   :  { %898 = vmatpush.bf16.msra.mxu0 %v1827_v41 }
  0x7c   :  { %999 = vmatpush.bf16.msra.mxu1 %v1835_v8 }
  0xbb   :  { %v708_v18 = vpop.f32.mrf.mxu0 }
  0xbc   :  { %v721_v19 = vpop.f32.mrf.mxu1  ;;  %v709_v30 = vadd.f32 %v1877_v26, %v708_v18 }
  0xbe   :  { %v722_v32 = vadd.f32 %v721_v19, %v709_v30  ;;  %v1847_v30 = vld [vmem:[#allocation10 + $0x20] sm:$0xff] }
  0xc3   :  { %v734_v20 = vpop.f32.mrf.mxu2  ;;  %v710_v23 = vpop.f32.mrf.mxu0 }
  0xc4   :  { %v747_v22 = vpop.f32.mrf.mxu3  ;;  %v723_v24 = vpop.f32.mrf.mxu1  ;;  %v735_v34 = vadd.f32 %v734_v20, %v722_v32  ;;  %v1845_v32 = vld [vmem:[#allocation10 + $0x10] sm:$0xff] }
  0xc6   :  { %v748_v36 = vadd.f32 %v747_v22, %v735_v34  ;;  %v1843_v34 = vld [vmem:[#allocation10] sm:$0xff] }
  0xcb   :  { %v736_v27 = vpop.f32.mrf.mxu2 }
  0xcc   :  { %v749_v29 = vpop.f32.mrf.mxu3  ;;  %v1850_v27 = vld [vmem:[#allocation10 + $0x38] sm:$0xff] }
  0xcd   :  { %1093 = vmatpush.bf16.msra.mxu2 %v1850_v27  ;;  %v1848_v29 = vld [vmem:[#allocation10 + $0x28] sm:$0xff] }
  0xd1   :  { %1094 = vmatpush.bf16.msra.mxu2 %v1849_v28 }
  0xd5   :  { %1095 = vmatpush.bf16.msra.mxu2 %v1848_v29 }
  0xd9   :  { %1096 = vmatpush.bf16.msra.mxu2 %v1847_v30 }
  0xdb   :  { %v760_v37 = vpop.f32.mrf.mxu0 }
  0xdc   :  { %v773_v38 = vpop.f32.mrf.mxu1  ;;  %v761_v40 = vadd.f32 %v760_v37, %v748_v36 }
  0xdd   :  { %1097 = vmatpush.bf16.msra.mxu2 %v1846_v31 }
  0xde   :  { %v774_v42 = vadd.f32 %v773_v38, %v761_v40 }
  0xe1   :  { %1098 = vmatpush.bf16.msra.mxu2 %v1845_v32 }
  0xe3   :  { %v786_v43 = vpop.f32.mrf.mxu2  ;;  %v762_v46 = vpop.f32.mrf.mxu0 }
  0xe4   :  { %v799_v44 = vpop.f32.mrf.mxu3  ;;  %v787_v45 = vadd.f32 %v786_v43, %v774_v42  ;;  %v775_v47 = vpop.f32.mrf.mxu1 }
  0xe5   :  { %1099 = vmatpush.bf16.msra.mxu2 %v1844_v33 }
  0xe6   :  { %v800_v48 = vadd.f32 %v799_v44, %v787_v45 }
  0xe8   :  { %v1598_v49 = vmul.f32 -1.442695, %v800_v48 }
  0xe9   :  { %1100 = vmatpush.bf16.msra.mxu2 %v1843_v34 }
  0xea   :  { %1883 = vpow2.f32 %v1598_v49 }
  0xeb   :  { %v788_v50 = vpop.f32.mrf.mxu2 }
  0xec   :  { %v801_v51 = vpop.f32.mrf.mxu3 }
  0xf0   :  { %v1884_v52 = vpop.eup %1883 }
  0xf1   :  { %v806_v53 = vadd.f32 1.0, %v1884_v52 }
  0xf3   :  { %1885 = vrcp.f32 %v806_v53  ;;  %v818_v57 = vand.u32 2147483648, %v806_v53  ;;  %v816_v59 = vand.u32 2147483647, %v806_v53  ;;  %vm812_vm1 = vweird.f32 %v806_v53 }
  0xf5   :  { %v819_v61 = vor.u32 1.1754944e-38, %v818_v57  ;;  %vm817_vm3 = vcmp.eq.f32.partialorder %v816_v59, 8.507059e+37  ;;  %v1854_v57 = vld [vmem:[#allocation11 + $0x18] sm:$0xff]  ;;  %v1852_v59 = vld [vmem:[#allocation11 + $0x8] sm:$0xff] }
  0xf9   :  { %v1886_v54 = vpop.eup %1885 }
  0xfa   :  { %v808_v55 = vmul.f32 %v1886_v54, %v806_v53  ;;  %vm813_vm0 = vweird.f32 %v1886_v54  ;;  %v1858_v53 = vld [vmem:[#allocation11 + $0x38] sm:$0xff] }
  0xfb   :  { %vm814_vm2 = vmor %vm812_vm1, %vm813_vm0  ;;  %1194 = vmatpush.bf16.msra.mxu3 %v1858_v53 }
  0xfc   :  { %v809_v56 = vsub.f32 1.0, %v808_v55  ;;  %v1856_v55 = vld [vmem:[#allocation11 + $0x28] sm:$0xff] }
  0xfe   :  { %v810_v58 = vmul.f32 %v1886_v54, %v809_v56  ;;  %v1855_v56 = vld [vmem:[#allocation11 + $0x20] sm:$0xff] }
 0x100   :  { %v811_v60 = vadd.f32 %v1886_v54, %v810_v58  ;;  %v1853_v58 = vld [vmem:[#allocation11 + $0x10] sm:$0xff] }
 0x102   :  { %v815_v62 = vsel %vm814_vm2, %v1886_v54, %v811_v60  ;;  %v1857_v54 = vld [vmem:[#allocation11 + $0x30] sm:$0xff]  ;;  %v1851_v60 = vld [vmem:[#allocation11] sm:$0xff] }
 0x103   :  { %v820_v63 = vsel %vm817_vm3, %v819_v61, %v815_v62  ;;  %1195 = vmatpush.bf16.msra.mxu3 %v1857_v54  ;;  %v1880_v61 = vld [vmem:[%s2257_s8] ss:$0 sm:$0xff] }
 0x104   :  { %v822_v0 = vpack.c.bf16 %v820_v63, %v820_v63 }
 0x106   :  { %899 = vmatmul.bf16.vlgmr.msra.gmra.mxu0 %v822_v0 }
 0x107   :  { %1196 = vmatpush.bf16.msra.mxu3 %v1856_v55 }
 0x10b   :  { %1197 = vmatpush.bf16.msra.mxu3 %v1855_v56 }
 0x10f   :  { %1198 = vmatpush.bf16.msra.mxu3 %v1854_v57 }
 0x113   :  { %1199 = vmatpush.bf16.msra.mxu3 %v1853_v58 }
 0x117   :  { %1200 = vmatpush.bf16.msra.mxu3 %v1852_v59 }
 0x11b   :  { %1201 = vmatpush.bf16.msra.mxu3 %v1851_v60 }
 0x183   :  { %v900_v10 = vpop.f32.mrf.mxu0 }
 0x184   :  { %v901_v11 = vadd.f32 %v1878_v9, %v900_v10 }
 0x186   :  { %v1631_v12 = vmul.f32 -1.442695, %v901_v11 }
 0x188   :  { %1887 = vpow2.f32 %v1631_v12 }
 0x18b   :  { %v902_v13 = vpop.f32.mrf.mxu0 }
 0x18e   :  { %v1888_v14 = vpop.eup %1887 }
 0x18f   :  { %v907_v15 = vadd.f32 1.0, %v1888_v14 }
 0x191   :  { %1889 = vrcp.f32 %v907_v15  ;;  %v919_v19 = vand.u32 2147483648, %v907_v15  ;;  %v917_v21 = vand.u32 2147483647, %v907_v15  ;;  %vm913_vm5 = vweird.f32 %v907_v15 }
 0x193   :  { %v920_v23 = vor.u32 1.1754944e-38, %v919_v19  ;;  %vm918_vm7 = vcmp.eq.f32.partialorder %v917_v21, 8.507059e+37  ;;  %v1862_v19 = vld [vmem:[#allocation13 + $0x18] sm:$0xff]  ;;  %v1860_v21 = vld [vmem:[#allocation13 + $0x8] sm:$0xff] }
 0x197   :  { %v1890_v16 = vpop.eup %1889 }
 0x198   :  { %v909_v17 = vmul.f32 %v1890_v16, %v907_v15  ;;  %vm914_vm4 = vweird.f32 %v1890_v16  ;;  %v1866_v15 = vld [vmem:[#allocation13 + $0x38] sm:$0xff] }
 0x199   :  { %vm915_vm6 = vmor %vm913_vm5, %vm914_vm4  ;;  %1295 = vmatpush.bf16.msrb.mxu0 %v1866_v15  ;;  %vm1308_vm4 = vcmask 1041408  }
 0x19a   :  { %v910_v18 = vsub.f32 1.0, %v909_v17  ;;  %v1864_v17 = vld [vmem:[#allocation13 + $0x28] sm:$0xff] }
 0x19c   :  { %v911_v20 = vmul.f32 %v1890_v16, %v910_v18  ;;  %v1863_v18 = vld [vmem:[#allocation13 + $0x20] sm:$0xff] }
 0x19e   :  { %v912_v22 = vadd.f32 %v1890_v16, %v911_v20  ;;  %v1861_v20 = vld [vmem:[#allocation13 + $0x10] sm:$0xff] }
 0x1a0   :  { %v916_v24 = vsel %vm915_vm6, %v1890_v16, %v912_v22  ;;  %v1865_v16 = vld [vmem:[#allocation13 + $0x30] sm:$0xff]  ;;  %v1859_v22 = vld [vmem:[#allocation13] sm:$0xff] }
 0x1a1   :  { %v921_v25 = vsel %vm918_vm7, %v920_v23, %v916_v24  ;;  %1296 = vmatpush.bf16.msrb.mxu0 %v1865_v16  ;;  %v1881_v23 = vld [vmem:[%s2259_s10] ss:$0 sm:$0xff] }
 0x1a2   :  { %v923_v26 = vpack.c.bf16 %v921_v25, %v921_v25 }
 0x1a4   :  { %1000 = vmatmul.bf16.vlgmr.msra.gmra.mxu1 %v923_v26 }
 0x1a5   :  { %1297 = vmatpush.bf16.msrb.mxu0 %v1864_v17 }
 0x1a9   :  { %1298 = vmatpush.bf16.msrb.mxu0 %v1863_v18 }
 0x1ad   :  { %1299 = vmatpush.bf16.msrb.mxu0 %v1862_v19 }
 0x1b1   :  { %1300 = vmatpush.bf16.msrb.mxu0 %v1861_v20 }
 0x1b5   :  { %1301 = vmatpush.bf16.msrb.mxu0 %v1860_v21 }
 0x1b9   :  { %1302 = vmatpush.bf16.msrb.mxu0 %v1859_v22 }
 0x221   :  { %v1001_v36 = vpop.f32.mrf.mxu1 }
 0x222   :  { %v1002_v37 = vadd.f32 %v1879_v35, %v1001_v36 }
 0x224   :  { %v1664_v38 = vmul.f32 -1.442695, %v1002_v37 }
 0x226   :  { %1891 = vpow2.f32 %v1664_v38 }
 0x229   :  { %v1003_v39 = vpop.f32.mrf.mxu1 }
 0x22c   :  { %v1892_v40 = vpop.eup %1891 }
 0x22d   :  { %v1008_v41 = vadd.f32 1.0, %v1892_v40 }
 0x22f   :  { %1893 = vrcp.f32 %v1008_v41  ;;  %v1020_v45 = vand.u32 2147483648, %v1008_v41  ;;  %v1018_v47 = vand.u32 2147483647, %v1008_v41  ;;  %vm1014_vm9 = vweird.f32 %v1008_v41 }
 0x231   :  { %v1021_v49 = vor.u32 1.1754944e-38, %v1020_v45  ;;  %vm1019_vm11 = vcmp.eq.f32.partialorder %v1018_v47, 8.507059e+37 }
 0x235   :  { %v1894_v42 = vpop.eup %1893 }
 0x236   :  { %v1010_v43 = vmul.f32 %v1894_v42, %v1008_v41  ;;  %vm1015_vm8 = vweird.f32 %v1894_v42  ;;  %v1882_v41 = vld [vmem:[%s2261_s12] ss:$0 sm:$0xff] }
 0x237   :  { %vm1016_vm10 = vmor %vm1014_vm9, %vm1015_vm8 }
 0x238   :  { %v1011_v44 = vsub.f32 1.0, %v1010_v43 }
 0x23a   :  { %v1012_v46 = vmul.f32 %v1894_v42, %v1011_v44 }
 0x23c   :  { %v1013_v48 = vadd.f32 %v1894_v42, %v1012_v46 }
 0x23e   :  { %v1017_v50 = vsel %vm1016_vm10, %v1894_v42, %v1013_v48 }
 0x23f   :  { %v1022_v51 = vsel %vm1019_vm11, %v1021_v49, %v1017_v50 }
 0x240   :  { %v1024_v52 = vpack.c.bf16 %v1022_v51, %v1022_v51 }
 0x242   :  { %1101 = vmatmul.bf16.vlgmr.msra.gmra.mxu2 %v1024_v52 }
 0x2c5   :  { %v1102_v62 = vpop.f32.mrf.mxu2 }
 0x2c6   :  { %v1103_v63 = vadd.f32 %v1880_v61, %v1102_v62 }
 0x2c8   :  { %v1697_v0 = vmul.f32 -1.442695, %v1103_v63 }
 0x2ca   :  { %1895 = vpow2.f32 %v1697_v0 }
 0x2cd   :  { %v1104_v1 = vpop.f32.mrf.mxu2 }
 0x2d0   :  { %v1896_v2 = vpop.eup %1895 }
 0x2d1   :  { %v1109_v3 = vadd.f32 1.0, %v1896_v2 }
 0x2d3   :  { %1897 = vrcp.f32 %v1109_v3  ;;  %v1121_v7 = vand.u32 2147483648, %v1109_v3  ;;  %v1119_v9 = vand.u32 2147483647, %v1109_v3  ;;  %vm1115_vm13 = vweird.f32 %v1109_v3 }
 0x2d5   :  { %v1122_v11 = vor.u32 1.1754944e-38, %v1121_v7  ;;  %vm1120_vm15 = vcmp.eq.f32.partialorder %v1119_v9, 8.507059e+37 }
 0x2d9   :  { %v1898_v4 = vpop.eup %1897 }
 0x2da   :  { %v1111_v5 = vmul.f32 %v1898_v4, %v1109_v3  ;;  %vm1116_vm12 = vweird.f32 %v1898_v4 }
 0x2db   :  { %vm1117_vm14 = vmor %vm1115_vm13, %vm1116_vm12 }
 0x2dc   :  { %v1112_v6 = vsub.f32 1.0, %v1111_v5 }
 0x2de   :  { %v1113_v8 = vmul.f32 %v1898_v4, %v1112_v6 }
 0x2e0   :  { %v1114_v10 = vadd.f32 %v1898_v4, %v1113_v8 }
 0x2e2   :  { %v1118_v12 = vsel %vm1117_vm14, %v1898_v4, %v1114_v10 }
 0x2e3   :  { %v1123_v13 = vsel %vm1120_vm15, %v1122_v11, %v1118_v12 }
 0x2e4   :  { %v1125_v14 = vpack.c.bf16 %v1123_v13, %v1123_v13 }
 0x2e6   :  { %1202 = vmatmul.bf16.vlgmr.msra.gmra.mxu3 %v1125_v14 }
 0x369   :  { %v1203_v24 = vpop.f32.mrf.mxu3 }
 0x36a   :  { %v1204_v25 = vadd.f32 %v1881_v23, %v1203_v24 }
 0x36c   :  { %v1730_v26 = vmul.f32 -1.442695, %v1204_v25 }
 0x36e   :  { %1899 = vpow2.f32 %v1730_v26 }
 0x371   :  { %v1205_v27 = vpop.f32.mrf.mxu3 }
 0x374   :  { %v1900_v28 = vpop.eup %1899 }
 0x375   :  { %v1210_v29 = vadd.f32 1.0, %v1900_v28 }
 0x377   :  { %1901 = vrcp.f32 %v1210_v29  ;;  %v1222_v33 = vand.u32 2147483648, %v1210_v29  ;;  %v1220_v35 = vand.u32 2147483647, %v1210_v29  ;;  %vm1216_vm1 = vweird.f32 %v1210_v29 }
 0x379   :  { %v1223_v37 = vor.u32 1.1754944e-38, %v1222_v33  ;;  %vm1221_vm3 = vcmp.eq.f32.partialorder %v1220_v35, 8.507059e+37 }
 0x37d   :  { %v1902_v30 = vpop.eup %1901 }
 0x37e   :  { %v1212_v31 = vmul.f32 %v1902_v30, %v1210_v29  ;;  %vm1217_vm0 = vweird.f32 %v1902_v30 }
 0x37f   :  { %vm1218_vm2 = vmor %vm1216_vm1, %vm1217_vm0 }
 0x380   :  { %v1213_v32 = vsub.f32 1.0, %v1212_v31 }
 0x382   :  { %v1214_v34 = vmul.f32 %v1902_v30, %v1213_v32 }
 0x384   :  { %v1215_v36 = vadd.f32 %v1902_v30, %v1214_v34 }
 0x386   :  { %v1219_v38 = vsel %vm1218_vm2, %v1902_v30, %v1215_v36 }
 0x387   :  { %v1224_v39 = vsel %vm1221_vm3, %v1223_v37, %v1219_v38 }
 0x388   :  { %v1226_v40 = vpack.c.bf16 %v1224_v39, %v1224_v39 }
 0x38a   :  { %1303 = vmatmul.bf16.vlgmr.msrb.gmra.mxu0 %v1226_v40 }
 0x407   :  { %v1304_v42 = vpop.f32.mrf.mxu0 }
 0x408   :  { %v1305_v43 = vadd.f32 %v1882_v41, %v1304_v42 }
 0x40a   :  { %v1309_v44 = vsel %vm1308_vm4, %v1305_v43, -inf }
 0x40b   :  { %1310 = vmax.xlane.f32.xlu0 %v1309_v44 }
 0x40f   :  { %v1306_v45 = vpop.f32.mrf.mxu0 }
 0x47e   :  { %v1311_v46 = vpop.xlane.xlu0 %1310 }
 0x47f   :  { %v1312_v47 = vsub.f32 %v1305_v43, %v1311_v46 }
 0x481   :  { %v1313_v48 = vmul.f32 1.442695, %v1312_v47 }
 0x483   :  { %1903 = vpow2.f32 %v1313_v48 }
 0x489   :  { %v1904_v49 = vpop.eup %1903 }
 0x48a   :  { %v1315_v50 = vsel %vm1308_vm4, %v1904_v49, 0.0 }
 0x48b   :  { %1316 = vadd.xlane.f32.xlu0 %v1315_v50 }
 0x4fe   :  { %v1317_v51 = vpop.xlane.xlu0 %1316 }
 0x4ff   :  { %1905 = vlog2.f32 %v1317_v51 }
 0x505   :  { %v1906_v52 = vpop.eup %1905 }
 0x506   :  { %v1319_v53 = vmul.f32 0.6931472, %v1906_v52 }
 0x508   :  { %v1320_v54 = vsub.f32 %v1312_v47, %v1319_v53 }
 0x50a   :  { %1321 = vst [vmem:[#allocation14] sm:$0x3] %v1320_v54 }
 0x50b   :  { %1332 = dma.vmem_to_hbm [thread:$0]  %s1328_s9, 32, %s1330_s28, [#allocation4]  }
 0x50c   :  { %2107 = dma.done.wait [#allocation4], 32  }
 0x50d   :  { %2108 = vsyncadd [#allocation4], 4294967264 }
 0x50e   :  { %1337 = vsyncpa [#allocation3], 1 }
 0x50f   :  { %1338 = vsyncpa [#allocation6], 1 }
 0x510   :  { %1339 = vsyncpa [#allocation9], 1 }
 0x511   :  { %1340 = vsyncpa [#allocation12], 1 }
 0x512   :  { %1341 = vsyncpa [#allocation4], 1 }

// kernel: tpu_custom_call.1
= control target key start
LH: loop header
LB: loop body
LE: loop exit
PB: predicated region body
PF: predicated region fallthrough
CT: control target
= control target key end

     0   :  { %18 = vsyncpa [#allocation3], 0  ;;  %s2249_s0 = inlined_call_operand.hbm [shape: f32[2,1024], index: 0, kind: input, shape index: {}]   ;;  %s2250_s1 = inlined_call_operand.hbm [shape: bf16[1024,128], index: 1, kind: input, shape index: {}]   ;;  %s2251_s2 = inlined_call_operand.vmem [shape: f32[1,128], index: 2, kind: input, shape index: {}]   ;;  %s2252_s3 = inlined_call_operand.hbm [shape: bf16[128,128], index: 3, kind: input, shape index: {}]   ;;  %s2253_s4 = inlined_call_operand.vmem [shape: f32[1,128], index: 4, kind: input, shape index: {}]   ;;  %s2254_s5 = inlined_call_operand.hbm [shape: bf16[128,128], index: 5, kind: input, shape index: {}]   ;;  %s2255_s6 = inlined_call_operand.vmem [shape: f32[1,128], index: 6, kind: input, shape index: {}]   ;;  %s2256_s7 = inlined_call_operand.hbm [shape: bf16[128,128], index: 7, kind: input, shape index: {}]   ;;  %s2257_s8 = inlined_call_operand.vmem [shape: f32[1,128], index: 8, kind: input, shape index: {}]   ;;  %s2258_s9 = inlined_call_operand.hbm [shape: bf16[128,128], index: 9, kind: input, shape index: {}]   ;;  %s2259_s10 = inlined_call_operand.vmem [shape: f32[1,128], index: 10, kind: input, shape index: {}]   ;;  %s2260_s11 = inlined_call_operand.hbm [shape: bf16[128,128], index: 11, kind: input, shape index: {}]   ;;  %s2261_s12 = inlined_call_operand.vmem [shape: f32[1,128], index: 12, kind: input, shape index: {}]   ;;  %s2262_s13 = inlined_call_operand.hbm [shape: f32[2,128], index: 13, kind: output, shape index: {}]  }
   0x1   :  { %19 = vsyncpa [#allocation6], 0 }
   0x2   :  { %20 = vsyncpa [#allocation9], 0 }
   0x3   :  { %21 = vsyncpa [#allocation12], 0  ;;  %s38_s27 = sshll.u32 %s2250_s1, 4  ;;  %s39_s27 = int_to_ptr.hbm [resolvable:$true] %s38_s27 }
   0x4   :  { %22 = vsyncpa [#allocation4], 0  ;;  %s2109_s28 = smov [#allocation5]   ;;  %s68_s15 = sshll.u32 %s2254_s5, 4  ;;  %s69_s15 = int_to_ptr.hbm [resolvable:$true] %s68_s15 }
   0x5   :  { %s40_s29 = sshll.u32 %s2109_s28, 4  ;;  %s2110_s16 = smov 64   ;;  %s41_s29 = int_to_ptr.vmem [resolvable:$true] %s40_s29 }
   0x6   :  { %s2111_s17 = smov 4   ;;  %s2112_s18 = smov [#allocation8]  }
   0x7   :  { %46 = dma.hbm_to_vmem [thread:$0]  %s39_s27, 8192, %s41_s29, [#allocation6], %s2110_s16, %s2110_s16, %s2111_s17  }
   0x8   :  { %s70_s19 = sshll.u32 %s2112_s18, 4  ;;  %s98_s21 = sshll.u32 %s2258_s9, 4  ;;  %s71_s19 = int_to_ptr.vmem [resolvable:$true] %s70_s19  ;;  %s99_s21 = int_to_ptr.hbm [resolvable:$true] %s98_s21 }
   0x9   :  { %76 = dma.hbm_to_vmem [thread:$0]  %s69_s15, 1024, %s71_s19, [#allocation9], %s2110_s16, %s2110_s16, %s2111_s17  }
   0xa   :  { %s28_s23 = sshll.u32 %s2249_s0, 4  ;;  %s2113_s24 = smov [#allocation11]   ;;  %s29_s23 = int_to_ptr.hbm [resolvable:$true] %s28_s23 }
   0xb   :  { %s100_s25 = sshll.u32 %s2113_s24, 4  ;;  %s2114_s26 = smov [#allocation2]   ;;  %s101_s25 = int_to_ptr.vmem [resolvable:$true] %s100_s25 }
   0xc   :  { %106 = dma.hbm_to_vmem [thread:$0]  %s99_s21, 1024, %s101_s25, [#allocation12], %s2110_s16, %s2110_s16, %s2111_s17  }
   0xd   :  { %s30_s9 = sshll.u32 %s2114_s26, 4  ;;  %s53_s29 = sshll.u32 %s2252_s3, 4  ;;  %s31_s9 = int_to_ptr.vmem [resolvable:$true] %s30_s9  ;;  %s54_s29 = int_to_ptr.hbm [resolvable:$true] %s53_s29 }
   0xe   :  { %33 = dma.hbm_to_vmem [thread:$0]  %s29_s23, 256, %s31_s9, [#allocation3]  }
   0xf   :  { %s83_s0 = sshll.u32 %s2256_s7, 4  ;;  %s2115_s15 = smov [#allocation7]   ;;  %s84_s0 = int_to_ptr.hbm [resolvable:$true] %s83_s0 }
  0x10   :  { %s55_s18 = sshll.u32 %s2115_s15, 4  ;;  %s2116_s19 = smov [#allocation10]   ;;  %s56_s18 = int_to_ptr.vmem [resolvable:$true] %s55_s18 }
  0x11   :  { %61 = dma.hbm_to_vmem [thread:$0]  %s54_s29, 1024, %s56_s18, [#allocation6], %s2110_s16, %s2110_s16, %s2111_s17  }
  0x12   :  { %s85_s20 = sshll.u32 %s2116_s19, 4  ;;  %s113_s3 = sshll.u32 %s2260_s11, 4  ;;  %s86_s20 = int_to_ptr.vmem [resolvable:$true] %s85_s20  ;;  %s114_s3 = int_to_ptr.hbm [resolvable:$true] %s113_s3 }
  0x13   :  { %91 = dma.hbm_to_vmem [thread:$0]  %s84_s0, 1024, %s86_s20, [#allocation9], %s2110_s16, %s2110_s16, %s2111_s17  }
  0x14   :  { %s2117_s7 = smov [#allocation13]  }
  0x15   :  { %s115_s5 = sshll.u32 %s2117_s7, 4  ;;  %s116_s5 = int_to_ptr.vmem [resolvable:$true] %s115_s5 }
  0x16   :  { %121 = dma.hbm_to_vmem [thread:$0]  %s114_s3, 1024, %s116_s5, [#allocation12], %s2110_s16, %s2110_s16, %s2111_s17  }
  0x17   :  { %2099 = dma.done.wait [#allocation3], 256  }
  0x18   :  { %2100 = vsyncadd [#allocation3], 4294967040 }
  0x19   :  { %2101 = dma.done.wait [#allocation6], 9216  }
  0x1a   :  { %2102 = vsyncadd [#allocation6], 4294958080 }
  0x1b   :  { %2103 = dma.done.wait [#allocation9], 2048  }
  0x1c   :  { %2104 = vsyncadd [#allocation9], 4294965248 }
  0x1d   :  { %2105 = dma.done.wait [#allocation12], 2048  }
  0x1e   :  { %2106 = vsyncadd [#allocation12], 4294965248  ;;  %v1770_v0 = vld [vmem:[#allocation5 + $0x38] sm:$0xff]  ;;  %v1769_v4 = vld [vmem:[#allocation5 + $0x30] sm:$0xff]  ;;  %s2118_s26 = smov [#allocation14]   ;;  %s1329_s28 = sshll.u32 %s2262_s13, 4  ;;  %s1330_s28 = int_to_ptr.hbm [resolvable:$true] %s1329_s28 }
  0x1f   :  { %v1778_v1 = vld [vmem:[#allocation5 + $0x78] sm:$0xff]  ;;  %699 = vmatpush.bf16.msra.mxu0 %v1770_v0  ;;  %v1777_v5 = vld [vmem:[#allocation5 + $0x70] sm:$0xff]  ;;  %v1768_v8 = vld [vmem:[#allocation5 + $0x28] sm:$0xff]  ;;  %s1327_s9 = sshll.u32 %s2118_s26, 4  ;;  %s1328_s9 = int_to_ptr.vmem [resolvable:$true] %s1327_s9 }
  0x20   :  { %v1786_v2 = vld [vmem:[#allocation5 + $0xb8] sm:$0xff]  ;;  %712 = vmatpush.bf16.msra.mxu1 %v1778_v1  ;;  %v1785_v6 = vld [vmem:[#allocation5 + $0xb0] sm:$0xff]  ;;  %v1776_v9 = vld [vmem:[#allocation5 + $0x68] sm:$0xff] }
  0x21   :  { %v1794_v3 = vld [vmem:[#allocation5 + $0xf8] sm:$0xff]  ;;  %725 = vmatpush.bf16.msra.mxu2 %v1786_v2  ;;  %v1793_v7 = vld [vmem:[#allocation5 + $0xf0] sm:$0xff]  ;;  %v1784_v10 = vld [vmem:[#allocation5 + $0xa8] sm:$0xff] }
  0x22   :  { %738 = vmatpush.bf16.msra.mxu3 %v1794_v3  ;;  %v1792_v11 = vld [vmem:[#allocation5 + $0xe8] sm:$0xff]  ;;  %v1767_v12 = vld [vmem:[#allocation5 + $0x20] sm:$0xff]  ;;  %v152_v16 = vld [vmem:[#allocation2] sm:$0xff] }
  0x23   :  { %700 = vmatpush.bf16.msra.mxu0 %v1769_v4  ;;  %v1775_v13 = vld [vmem:[#allocation5 + $0x60] sm:$0xff]  ;;  %v1766_v17 = vld [vmem:[#allocation5 + $0x18] sm:$0xff]  ;;  %156 = vst [vmem:[#allocation1] ss:$4 sm:$0xff] %v152_v16  ;;  %v1765_v21 = vld [vmem:[#allocation5 + $0x10] sm:$0xff] }
  0x24   :  { %713 = vmatpush.bf16.msra.mxu1 %v1777_v5  ;;  %v1783_v14 = vld [vmem:[#allocation5 + $0xa0] sm:$0xff]  ;;  %v1774_v18 = vld [vmem:[#allocation5 + $0x58] sm:$0xff]  ;;  %v1773_v22 = vld [vmem:[#allocation5 + $0x50] sm:$0xff] }
  0x25   :  { %726 = vmatpush.bf16.msra.mxu2 %v1785_v6  ;;  %v1791_v15 = vld [vmem:[#allocation5 + $0xe0] sm:$0xff]  ;;  %v1782_v19 = vld [vmem:[#allocation5 + $0x98] sm:$0xff]  ;;  %v1781_v23 = vld [vmem:[#allocation5 + $0x90] sm:$0xff] }
  0x26   :  { %739 = vmatpush.bf16.msra.mxu3 %v1793_v7  ;;  %v1790_v20 = vld [vmem:[#allocation5 + $0xd8] sm:$0xff]  ;;  %v1789_v24 = vld [vmem:[#allocation5 + $0xd0] sm:$0xff]  ;;  %v1764_v25 = vld [vmem:[#allocation5 + $0x8] sm:$0xff] }
  0x27   :  { %701 = vmatpush.bf16.msra.mxu0 %v1768_v8  ;;  %v1772_v26 = vld [vmem:[#allocation5 + $0x48] sm:$0xff]  ;;  %v153_v29 = vld [vmem:[#allocation2 + $0x8] sm:$0xff]  ;;  %v1763_v30 = vld [vmem:[#allocation5] sm:$0xff] }
  0x28   :  { %714 = vmatpush.bf16.msra.mxu1 %v1776_v9  ;;  %v1780_v27 = vld [vmem:[#allocation5 + $0x88] sm:$0xff]  ;;  %v1771_v31 = vld [vmem:[#allocation5 + $0x40] sm:$0xff]  ;;  %158 = vst [vmem:[#allocation1 + $0x20] ss:$4 sm:$0xff] %v153_v29  ;;  %v1802_v34 = vld [vmem:[#allocation5 + $0x138] sm:$0xff] }
  0x29   :  { %727 = vmatpush.bf16.msra.mxu2 %v1784_v10  ;;  %v1788_v28 = vld [vmem:[#allocation5 + $0xc8] sm:$0xff]  ;;  %v1779_v32 = vld [vmem:[#allocation5 + $0x80] sm:$0xff]  ;;  %v1810_v35 = vld [vmem:[#allocation5 + $0x178] sm:$0xff] }
  0x2a   :  { %740 = vmatpush.bf16.msra.mxu3 %v1792_v11  ;;  %v1787_v33 = vld [vmem:[#allocation5 + $0xc0] sm:$0xff]  ;;  %v161_v36 = vld.sshfl [vmem:[#allocation1 + $0x10] sm:$0xff pattern:$0x73625140]  ;;  %v1801_v46 = vld [vmem:[#allocation5 + $0x130] sm:$0xff] }
  0x2b   :  { %702 = vmatpush.bf16.msra.mxu0 %v1767_v12  ;;  %v159_v37 = vld.sshfl [vmem:[#allocation1] sm:$0xff pattern:$0x73625140]  ;;  %v162_v38 = vld.sshfl [vmem:[#allocation1 + $0x18] sm:$0xff pattern:$0x73625140]  ;;  %v177_v42 = vpack.c.bf16 %v161_v36, %v161_v36 }
  0x2c   :  { %715 = vmatpush.bf16.msra.mxu1 %v1775_v13  ;;  %v160_v39 = vld.sshfl [vmem:[#allocation1 + $0x8] sm:$0xff pattern:$0x73625140]  ;;  %v1818_v40 = vld [vmem:[#allocation5 + $0x1b8] sm:$0xff]  ;;  %v175_v43 = vpack.c.bf16 %v159_v37, %v159_v37  ;;  %v178_v44 = vpack.c.bf16 %v162_v38, %v162_v38  ;;  %v1800_v50 = vld [vmem:[#allocation5 + $0x128] sm:$0xff] }
  0x2d   :  { %728 = vmatpush.bf16.msra.mxu2 %v1783_v14  ;;  %v1826_v41 = vld [vmem:[#allocation5 + $0x1f8] sm:$0xff]  ;;  %v176_v45 = vpack.c.bf16 %v160_v39, %v160_v39  ;;  %v1809_v47 = vld [vmem:[#allocation5 + $0x170] sm:$0xff]  ;;  %v1808_v51 = vld [vmem:[#allocation5 + $0x168] sm:$0xff] }
  0x2e   :  { %741 = vmatpush.bf16.msra.mxu3 %v1791_v15  ;;  %v1817_v48 = vld [vmem:[#allocation5 + $0x1b0] sm:$0xff]  ;;  %v1816_v52 = vld [vmem:[#allocation5 + $0x1a8] sm:$0xff]  ;;  %v1799_v54 = vld [vmem:[#allocation5 + $0x120] sm:$0xff] }
  0x2f   :  { %703 = vmatpush.bf16.msra.mxu0 %v1766_v17  ;;  %v1825_v49 = vld [vmem:[#allocation5 + $0x1f0] sm:$0xff]  ;;  %v1824_v53 = vld [vmem:[#allocation5 + $0x1e8] sm:$0xff]  ;;  %v1807_v55 = vld [vmem:[#allocation5 + $0x160] sm:$0xff] }
  0x30   :  { %716 = vmatpush.bf16.msra.mxu1 %v1774_v18  ;;  %v1815_v56 = vld [vmem:[#allocation5 + $0x1a0] sm:$0xff]  ;;  %v1798_v58 = vld [vmem:[#allocation5 + $0x118] sm:$0xff]  ;;  %v1797_v62 = vld [vmem:[#allocation5 + $0x110] sm:$0xff] }
  0x31   :  { %729 = vmatpush.bf16.msra.mxu2 %v1782_v19  ;;  %v1823_v57 = vld [vmem:[#allocation5 + $0x1e0] sm:$0xff]  ;;  %v1806_v59 = vld [vmem:[#allocation5 + $0x158] sm:$0xff]  ;;  %v1805_v63 = vld [vmem:[#allocation5 + $0x150] sm:$0xff] }
  0x32   :  { %742 = vmatpush.bf16.msra.mxu3 %v1790_v20  ;;  %v1814_v60 = vld [vmem:[#allocation5 + $0x198] sm:$0xff]  ;;  %v1813_v0 = vld [vmem:[#allocation5 + $0x190] sm:$0xff]  ;;  %v1796_v2 = vld [vmem:[#allocation5 + $0x108] sm:$0xff] }
  0x33   :  { %704 = vmatpush.bf16.msra.mxu0 %v1765_v21  ;;  %v1822_v61 = vld [vmem:[#allocation5 + $0x1d8] sm:$0xff]  ;;  %v1821_v1 = vld [vmem:[#allocation5 + $0x1d0] sm:$0xff]  ;;  %v1804_v3 = vld [vmem:[#allocation5 + $0x148] sm:$0xff] }
  0x34   :  { %717 = vmatpush.bf16.msra.mxu1 %v1773_v22  ;;  %v1812_v4 = vld [vmem:[#allocation5 + $0x188] sm:$0xff]  ;;  %v1795_v6 = vld [vmem:[#allocation5 + $0x100] sm:$0xff]  ;;  %v164_v11 = vld.sshfl [vmem:[#allocation1 + $0x28] sm:$0xff pattern:$0x73625140] }
  0x35   :  { %730 = vmatpush.bf16.msra.mxu2 %v1781_v23  ;;  %v1820_v5 = vld [vmem:[#allocation5 + $0x1c8] sm:$0xff]  ;;  %v1803_v7 = vld [vmem:[#allocation5 + $0x140] sm:$0xff]  ;;  %v165_v12 = vld.sshfl [vmem:[#allocation1 + $0x30] sm:$0xff pattern:$0x73625140]  ;;  %v180_v15 = vpack.c.bf16 %v164_v11, %v164_v11 }
  0x36   :  { %743 = vmatpush.bf16.msra.mxu3 %v1789_v24  ;;  %v1811_v8 = vld [vmem:[#allocation5 + $0x180] sm:$0xff]  ;;  %v163_v10 = vld.sshfl [vmem:[#allocation1 + $0x20] sm:$0xff pattern:$0x73625140]  ;;  %v181_v16 = vpack.c.bf16 %v165_v12, %v165_v12  ;;  %v1834_v21 = vld [vmem:[#allocation7 + $0x38] sm:$0xff] }
  0x37   :  { %705 = vmatpush.bf16.msra.mxu0 %v1764_v25  ;;  %v1819_v9 = vld [vmem:[#allocation5 + $0x1c0] sm:$0xff]  ;;  %v179_v14 = vpack.c.bf16 %v163_v10, %v163_v10  ;;  %v1833_v25 = vld [vmem:[#allocation7 + $0x30] sm:$0xff]  ;;  %v1828_v39 = vld [vmem:[#allocation7 + $0x8] sm:$0xff] }
  0x38   :  { %718 = vmatpush.bf16.msra.mxu1 %v1772_v26  ;;  %v166_v13 = vld.sshfl [vmem:[#allocation1 + $0x38] sm:$0xff pattern:$0x73625140]  ;;  %v1877_v26 = vld [vmem:[%s2251_s2] ss:$0 sm:$0xff] }
  0x39   :  { %731 = vmatpush.bf16.msra.mxu2 %v1780_v27  ;;  %v182_v17 = vpack.c.bf16 %v166_v13, %v166_v13 }
  0x3a   :  { %744 = vmatpush.bf16.msra.mxu3 %v1788_v28  ;;  %v1832_v28 = vld [vmem:[#allocation7 + $0x28] sm:$0xff] }
  0x3b   :  { %706 = vmatpush.bf16.msra.mxu0 %v1763_v30 }
  0x3c   :  { %719 = vmatpush.bf16.msra.mxu1 %v1771_v31  ;;  %v1831_v31 = vld [vmem:[#allocation7 + $0x20] sm:$0xff] }
  0x3d   :  { %732 = vmatpush.bf16.msra.mxu2 %v1779_v32 }
  0x3e   :  { %745 = vmatpush.bf16.msra.mxu3 %v1787_v33  ;;  %707 = vmatmul.bf16.vlgmr.msra.gmra.mxu0 %v175_v43  ;;  %v1830_v33 = vld [vmem:[#allocation7 + $0x18] sm:$0xff] }
  0x3f   :  { %751 = vmatpush.bf16.msrb.mxu0 %v1802_v34  ;;  %720 = vmatmul.bf16.vlgmr.msra.gmra.mxu1 %v176_v45 }
  0x40   :  { %764 = vmatpush.bf16.msrb.mxu1 %v1810_v35  ;;  %733 = vmatmul.bf16.vlgmr.msra.gmra.mxu2 %v177_v42  ;;  %v1829_v35 = vld [vmem:[#allocation7 + $0x10] sm:$0xff] }
  0x41   :  { %777 = vmatpush.bf16.msrb.mxu2 %v1818_v40  ;;  %746 = vmatmul.bf16.vlgmr.msra.gmra.mxu3 %v178_v44 }
  0x42   :  { %790 = vmatpush.bf16.msrb.mxu3 %v1826_v41  ;;  %v1827_v41 = vld [vmem:[#allocation7] sm:$0xff] }
  0x43   :  { %752 = vmatpush.bf16.msrb.mxu0 %v1801_v46 }
  0x44   :  { %765 = vmatpush.bf16.msrb.mxu1 %v1809_v47 }
  0x45   :  { %778 = vmatpush.bf16.msrb.mxu2 %v1817_v48 }
  0x46   :  { %791 = vmatpush.bf16.msrb.mxu3 %v1825_v49 }
  0x47   :  { %753 = vmatpush.bf16.msrb.mxu0 %v1800_v50 }
  0x48   :  { %766 = vmatpush.bf16.msrb.mxu1 %v1808_v51 }
  0x49   :  { %779 = vmatpush.bf16.msrb.mxu2 %v1816_v52 }
  0x4a   :  { %792 = vmatpush.bf16.msrb.mxu3 %v1824_v53 }
  0x4b   :  { %754 = vmatpush.bf16.msrb.mxu0 %v1799_v54 }
  0x4c   :  { %767 = vmatpush.bf16.msrb.mxu1 %v1807_v55 }
  0x4d   :  { %780 = vmatpush.bf16.msrb.mxu2 %v1815_v56 }
  0x4e   :  { %793 = vmatpush.bf16.msrb.mxu3 %v1823_v57 }
  0x4f   :  { %755 = vmatpush.bf16.msrb.mxu0 %v1798_v58 }
  0x50   :  { %768 = vmatpush.bf16.msrb.mxu1 %v1806_v59 }
  0x51   :  { %781 = vmatpush.bf16.msrb.mxu2 %v1814_v60 }
  0x52   :  { %794 = vmatpush.bf16.msrb.mxu3 %v1822_v61 }
  0x53   :  { %756 = vmatpush.bf16.msrb.mxu0 %v1797_v62 }
  0x54   :  { %769 = vmatpush.bf16.msrb.mxu1 %v1805_v63 }
  0x55   :  { %782 = vmatpush.bf16.msrb.mxu2 %v1813_v0 }
  0x56   :  { %795 = vmatpush.bf16.msrb.mxu3 %v1821_v1  ;;  %v1842_v1 = vld [vmem:[#allocation8 + $0x38] sm:$0xff] }
  0x57   :  { %757 = vmatpush.bf16.msrb.mxu0 %v1796_v2  ;;  %v1841_v2 = vld [vmem:[#allocation8 + $0x30] sm:$0xff] }
  0x58   :  { %770 = vmatpush.bf16.msrb.mxu1 %v1804_v3  ;;  %v1840_v3 = vld [vmem:[#allocation8 + $0x28] sm:$0xff] }
  0x59   :  { %783 = vmatpush.bf16.msrb.mxu2 %v1812_v4  ;;  %v1839_v4 = vld [vmem:[#allocation8 + $0x20] sm:$0xff] }
  0x5a   :  { %796 = vmatpush.bf16.msrb.mxu3 %v1820_v5  ;;  %v1838_v5 = vld [vmem:[#allocation8 + $0x18] sm:$0xff] }
  0x5b   :  { %758 = vmatpush.bf16.msrb.mxu0 %v1795_v6  ;;  %v1837_v6 = vld [vmem:[#allocation8 + $0x10] sm:$0xff] }
  0x5c   :  { %771 = vmatpush.bf16.msrb.mxu1 %v1803_v7  ;;  %v1836_v7 = vld [vmem:[#allocation8 + $0x8] sm:$0xff] }
  0x5d   :  { %784 = vmatpush.bf16.msrb.mxu2 %v1811_v8  ;;  %v1835_v8 = vld [vmem:[#allocation8] sm:$0xff] }
  0x5e   :  { %797 = vmatpush.bf16.msrb.mxu3 %v1819_v9  ;;  %759 = vmatmul.bf16.vlgmr.msrb.gmra.mxu0 %v179_v14  ;;  %v1878_v9 = vld [vmem:[%s2253_s4] ss:$0 sm:$0xff] }
  0x5f   :  { %772 = vmatmul.bf16.vlgmr.msrb.gmra.mxu1 %v180_v15  ;;  %891 = vmatpush.bf16.msra.mxu0 %v1834_v21 }
  0x60   :  { %785 = vmatmul.bf16.vlgmr.msrb.gmra.mxu2 %v181_v16  ;;  %992 = vmatpush.bf16.msra.mxu1 %v1842_v1 }
  0x61   :  { %798 = vmatmul.bf16.vlgmr.msrb.gmra.mxu3 %v182_v17 }
  0x63   :  { %892 = vmatpush.bf16.msra.mxu0 %v1833_v25 }
  0x64   :  { %993 = vmatpush.bf16.msra.mxu1 %v1841_v2 }
  0x67   :  { %893 = vmatpush.bf16.msra.mxu0 %v1832_v28  ;;  %v1849_v28 = vld [vmem:[#allocation10 + $0x30] sm:$0xff] }
  0x68   :  { %994 = vmatpush.bf16.msra.mxu1 %v1840_v3 }
  0x6b   :  { %894 = vmatpush.bf16.msra.mxu0 %v1831_v31  ;;  %v1846_v31 = vld [vmem:[#allocation10 + $0x18] sm:$0xff] }
  0x6c   :  { %995 = vmatpush.bf16.msra.mxu1 %v1839_v4 }
  0x6f   :  { %895 = vmatpush.bf16.msra.mxu0 %v1830_v33  ;;  %v1844_v33 = vld [vmem:[#allocation10 + $0x8] sm:$0xff] }
  0x70   :  { %996 = vmatpush.bf16.msra.mxu1 %v1838_v5 }
  0x73   :  { %896 = vmatpush.bf16.msra.mxu0 %v1829_v35  ;;  %v1879_v35 = vld [vmem:[%s2255_s6] ss:$0 sm:$0xff] }
  0x74   :  { %997 = vmatpush.bf16.msra.mxu1 %v1837_v6 }
  0x77   :  { %897 = vmatpush.bf16.msra.mxu0 %v1828_v39 }
  0x78   :  { %998 = vmatpush.bf16.msra.mxu1 %v1836_v7 }
  0x7b   :  { %898 = vmatpush.bf16.msra.mxu0 %v1827_v41 }
  0x7c   :  { %999 = vmatpush.bf16.msra.mxu1 %v1835_v8 }
  0xbb   :  { %v708_v18 = vpop.f32.mrf.mxu0 }
  0xbc   :  { %v721_v19 = vpop.f32.mrf.mxu1  ;;  %v709_v30 = vadd.f32 %v1877_v26, %v708_v18 }
  0xbe   :  { %v722_v32 = vadd.f32 %v721_v19, %v709_v30  ;;  %v1847_v30 = vld [vmem:[#allocation10 + $0x20] sm:$0xff] }
  0xc3   :  { %v734_v20 = vpop.f32.mrf.mxu2  ;;  %v710_v23 = vpop.f32.mrf.mxu0 }
  0xc4   :  { %v747_v22 = vpop.f32.mrf.mxu3  ;;  %v723_v24 = vpop.f32.mrf.mxu1  ;;  %v735_v34 = vadd.f32 %v734_v20, %v722_v32  ;;  %v1845_v32 = vld [vmem:[#allocation10 + $0x10] sm:$0xff] }
  0xc6   :  { %v748_v36 = vadd.f32 %v747_v22, %v735_v34  ;;  %v1843_v34 = vld [vmem:[#allocation10] sm:$0xff] }
  0xcb   :  { %v736_v27 = vpop.f32.mrf.mxu2 }
  0xcc   :  { %v749_v29 = vpop.f32.mrf.mxu3  ;;  %v1850_v27 = vld [vmem:[#allocation10 + $0x38] sm:$0xff] }
  0xcd   :  { %1093 = vmatpush.bf16.msra.mxu2 %v1850_v27  ;;  %v1848_v29 = vld [vmem:[#allocation10 + $0x28] sm:$0xff] }
  0xd1   :  { %1094 = vmatpush.bf16.msra.mxu2 %v1849_v28 }
  0xd5   :  { %1095 = vmatpush.bf16.msra.mxu2 %v1848_v29 }
  0xd9   :  { %1096 = vmatpush.bf16.msra.mxu2 %v1847_v30 }
  0xdb   :  { %v760_v37 = vpop.f32.mrf.mxu0 }
  0xdc   :  { %v773_v38 = vpop.f32.mrf.mxu1  ;;  %v761_v40 = vadd.f32 %v760_v37, %v748_v36 }
  0xdd   :  { %1097 = vmatpush.bf16.msra.mxu2 %v1846_v31 }
  0xde   :  { %v774_v42 = vadd.f32 %v773_v38, %v761_v40 }
  0xe1   :  { %1098 = vmatpush.bf16.msra.mxu2 %v1845_v32 }
  0xe3   :  { %v786_v43 = vpop.f32.mrf.mxu2  ;;  %v762_v46 = vpop.f32.mrf.mxu0 }
  0xe4   :  { %v799_v44 = vpop.f32.mrf.mxu3  ;;  %v787_v45 = vadd.f32 %v786_v43, %v774_v42  ;;  %v775_v47 = vpop.f32.mrf.mxu1 }
  0xe5   :  { %1099 = vmatpush.bf16.msra.mxu2 %v1844_v33 }
  0xe6   :  { %v800_v48 = vadd.f32 %v799_v44, %v787_v45 }
  0xe8   :  { %v1598_v49 = vmul.f32 -1.442695, %v800_v48 }
  0xe9   :  { %1100 = vmatpush.bf16.msra.mxu2 %v1843_v34 }
  0xea   :  { %1883 = vpow2.f32 %v1598_v49 }
  0xeb   :  { %v788_v50 = vpop.f32.mrf.mxu2 }
  0xec   :  { %v801_v51 = vpop.f32.mrf.mxu3 }
  0xf0   :  { %v1884_v52 = vpop.eup %1883 }
  0xf1   :  { %v806_v53 = vadd.f32 1.0, %v1884_v52 }
  0xf3   :  { %1885 = vrcp.f32 %v806_v53  ;;  %v818_v57 = vand.u32 2147483648, %v806_v53  ;;  %v816_v59 = vand.u32 2147483647, %v806_v53  ;;  %vm812_vm1 = vweird.f32 %v806_v53 }
  0xf5   :  { %v819_v61 = vor.u32 1.1754944e-38, %v818_v57  ;;  %vm817_vm3 = vcmp.eq.f32.partialorder %v816_v59, 8.507059e+37  ;;  %v1854_v57 = vld [vmem:[#allocation11 + $0x18] sm:$0xff]  ;;  %v1852_v59 = vld [vmem:[#allocation11 + $0x8] sm:$0xff] }
  0xf9   :  { %v1886_v54 = vpop.eup %1885 }
  0xfa   :  { %v808_v55 = vmul.f32 %v1886_v54, %v806_v53  ;;  %vm813_vm0 = vweird.f32 %v1886_v54  ;;  %v1858_v53 = vld [vmem:[#allocation11 + $0x38] sm:$0xff] }
  0xfb   :  { %vm814_vm2 = vmor %vm812_vm1, %vm813_vm0  ;;  %1194 = vmatpush.bf16.msra.mxu3 %v1858_v53 }
  0xfc   :  { %v809_v56 = vsub.f32 1.0, %v808_v55  ;;  %v1856_v55 = vld [vmem:[#allocation11 + $0x28] sm:$0xff] }
  0xfe   :  { %v810_v58 = vmul.f32 %v1886_v54, %v809_v56  ;;  %v1855_v56 = vld [vmem:[#allocation11 + $0x20] sm:$0xff] }
 0x100   :  { %v811_v60 = vadd.f32 %v1886_v54, %v810_v58  ;;  %v1853_v58 = vld [vmem:[#allocation11 + $0x10] sm:$0xff] }
 0x102   :  { %v815_v62 = vsel %vm814_vm2, %v1886_v54, %v811_v60  ;;  %v1857_v54 = vld [vmem:[#allocation11 + $0x30] sm:$0xff]  ;;  %v1851_v60 = vld [vmem:[#allocation11] sm:$0xff] }
 0x103   :  { %v820_v63 = vsel %vm817_vm3, %v819_v61, %v815_v62  ;;  %1195 = vmatpush.bf16.msra.mxu3 %v1857_v54  ;;  %v1880_v61 = vld [vmem:[%s2257_s8] ss:$0 sm:$0xff] }
 0x104   :  { %v822_v0 = vpack.c.bf16 %v820_v63, %v820_v63 }
 0x106   :  { %899 = vmatmul.bf16.vlgmr.msra.gmra.mxu0 %v822_v0 }
 0x107   :  { %1196 = vmatpush.bf16.msra.mxu3 %v1856_v55 }
 0x10b   :  { %1197 = vmatpush.bf16.msra.mxu3 %v1855_v56 }
 0x10f   :  { %1198 = vmatpush.bf16.msra.mxu3 %v1854_v57 }
 0x113   :  { %1199 = vmatpush.bf16.msra.mxu3 %v1853_v58 }
 0x117   :  { %1200 = vmatpush.bf16.msra.mxu3 %v1852_v59 }
 0x11b   :  { %1201 = vmatpush.bf16.msra.mxu3 %v1851_v60 }
 0x183   :  { %v900_v10 = vpop.f32.mrf.mxu0 }
 0x184   :  { %v901_v11 = vadd.f32 %v1878_v9, %v900_v10 }
 0x186   :  { %v1631_v12 = vmul.f32 -1.442695, %v901_v11 }
 0x188   :  { %1887 = vpow2.f32 %v1631_v12 }
 0x18b   :  { %v902_v13 = vpop.f32.mrf.mxu0 }
 0x18e   :  { %v1888_v14 = vpop.eup %1887 }
 0x18f   :  { %v907_v15 = vadd.f32 1.0, %v1888_v14 }
 0x191   :  { %1889 = vrcp.f32 %v907_v15  ;;  %v919_v19 = vand.u32 2147483648, %v907_v15  ;;  %v917_v21 = vand.u32 2147483647, %v907_v15  ;;  %vm913_vm5 = vweird.f32 %v907_v15 }
 0x193   :  { %v920_v23 = vor.u32 1.1754944e-38, %v919_v19  ;;  %vm918_vm7 = vcmp.eq.f32.partialorder %v917_v21, 8.507059e+37  ;;  %v1862_v19 = vld [vmem:[#allocation13 + $0x18] sm:$0xff]  ;;  %v1860_v21 = vld [vmem:[#allocation13 + $0x8] sm:$0xff] }
 0x197   :  { %v1890_v16 = vpop.eup %1889 }
 0x198   :  { %v909_v17 = vmul.f32 %v1890_v16, %v907_v15  ;;  %vm914_vm4 = vweird.f32 %v1890_v16  ;;  %v1866_v15 = vld [vmem:[#allocation13 + $0x38] sm:$0xff] }
 0x199   :  { %vm915_vm6 = vmor %vm913_vm5, %vm914_vm4  ;;  %1295 = vmatpush.bf16.msrb.mxu0 %v1866_v15  ;;  %vm1308_vm4 = vcmask 1041408  }
 0x19a   :  { %v910_v18 = vsub.f32 1.0, %v909_v17  ;;  %v1864_v17 = vld [vmem:[#allocation13 + $0x28] sm:$0xff] }
 0x19c   :  { %v911_v20 = vmul.f32 %v1890_v16, %v910_v18  ;;  %v1863_v18 = vld [vmem:[#allocation13 + $0x20] sm:$0xff] }
 0x19e   :  { %v912_v22 = vadd.f32 %v1890_v16, %v911_v20  ;;  %v1861_v20 = vld [vmem:[#allocation13 + $0x10] sm:$0xff] }
 0x1a0   :  { %v916_v24 = vsel %vm915_vm6, %v1890_v16, %v912_v22  ;;  %v1865_v16 = vld [vmem:[#allocation13 + $0x30] sm:$0xff]  ;;  %v1859_v22 = vld [vmem:[#allocation13] sm:$0xff] }
 0x1a1   :  { %v921_v25 = vsel %vm918_vm7, %v920_v23, %v916_v24  ;;  %1296 = vmatpush.bf16.msrb.mxu0 %v1865_v16  ;;  %v1881_v23 = vld [vmem:[%s2259_s10] ss:$0 sm:$0xff] }
 0x1a2   :  { %v923_v26 = vpack.c.bf16 %v921_v25, %v921_v25 }
 0x1a4   :  { %1000 = vmatmul.bf16.vlgmr.msra.gmra.mxu1 %v923_v26 }
 0x1a5   :  { %1297 = vmatpush.bf16.msrb.mxu0 %v1864_v17 }
 0x1a9   :  { %1298 = vmatpush.bf16.msrb.mxu0 %v1863_v18 }
 0x1ad   :  { %1299 = vmatpush.bf16.msrb.mxu0 %v1862_v19 }
 0x1b1   :  { %1300 = vmatpush.bf16.msrb.mxu0 %v1861_v20 }
 0x1b5   :  { %1301 = vmatpush.bf16.msrb.mxu0 %v1860_v21 }
 0x1b9   :  { %1302 = vmatpush.bf16.msrb.mxu0 %v1859_v22 }
 0x221   :  { %v1001_v36 = vpop.f32.mrf.mxu1 }
 0x222   :  { %v1002_v37 = vadd.f32 %v1879_v35, %v1001_v36 }
 0x224   :  { %v1664_v38 = vmul.f32 -1.442695, %v1002_v37 }
 0x226   :  { %1891 = vpow2.f32 %v1664_v38 }
 0x229   :  { %v1003_v39 = vpop.f32.mrf.mxu1 }
 0x22c   :  { %v1892_v40 = vpop.eup %1891 }
 0x22d   :  { %v1008_v41 = vadd.f32 1.0, %v1892_v40 }
 0x22f   :  { %1893 = vrcp.f32 %v1008_v41  ;;  %v1020_v45 = vand.u32 2147483648, %v1008_v41  ;;  %v1018_v47 = vand.u32 2147483647, %v1008_v41  ;;  %vm1014_vm9 = vweird.f32 %v1008_v41 }
 0x231   :  { %v1021_v49 = vor.u32 1.1754944e-38, %v1020_v45  ;;  %vm1019_vm11 = vcmp.eq.f32.partialorder %v1018_v47, 8.507059e+37 }
 0x235   :  { %v1894_v42 = vpop.eup %1893 }
 0x236   :  { %v1010_v43 = vmul.f32 %v1894_v42, %v1008_v41  ;;  %vm1015_vm8 = vweird.f32 %v1894_v42  ;;  %v1882_v41 = vld [vmem:[%s2261_s12] ss:$0 sm:$0xff] }
 0x237   :  { %vm1016_vm10 = vmor %vm1014_vm9, %vm1015_vm8 }
 0x238   :  { %v1011_v44 = vsub.f32 1.0, %v1010_v43 }
 0x23a   :  { %v1012_v46 = vmul.f32 %v1894_v42, %v1011_v44 }
 0x23c   :  { %v1013_v48 = vadd.f32 %v1894_v42, %v1012_v46 }
 0x23e   :  { %v1017_v50 = vsel %vm1016_vm10, %v1894_v42, %v1013_v48 }
 0x23f   :  { %v1022_v51 = vsel %vm1019_vm11, %v1021_v49, %v1017_v50 }
 0x240   :  { %v1024_v52 = vpack.c.bf16 %v1022_v51, %v1022_v51 }
 0x242   :  { %1101 = vmatmul.bf16.vlgmr.msra.gmra.mxu2 %v1024_v52 }
 0x2c5   :  { %v1102_v62 = vpop.f32.mrf.mxu2 }
 0x2c6   :  { %v1103_v63 = vadd.f32 %v1880_v61, %v1102_v62 }
 0x2c8   :  { %v1697_v0 = vmul.f32 -1.442695, %v1103_v63 }
 0x2ca   :  { %1895 = vpow2.f32 %v1697_v0 }
 0x2cd   :  { %v1104_v1 = vpop.f32.mrf.mxu2 }
 0x2d0   :  { %v1896_v2 = vpop.eup %1895 }
 0x2d1   :  { %v1109_v3 = vadd.f32 1.0, %v1896_v2 }
 0x2d3   :  { %1897 = vrcp.f32 %v1109_v3  ;;  %v1121_v7 = vand.u32 2147483648, %v1109_v3  ;;  %v1119_v9 = vand.u32 2147483647, %v1109_v3  ;;  %vm1115_vm13 = vweird.f32 %v1109_v3 }
 0x2d5   :  { %v1122_v11 = vor.u32 1.1754944e-38, %v1121_v7  ;;  %vm1120_vm15 = vcmp.eq.f32.partialorder %v1119_v9, 8.507059e+37 }
 0x2d9   :  { %v1898_v4 = vpop.eup %1897 }
 0x2da   :  { %v1111_v5 = vmul.f32 %v1898_v4, %v1109_v3  ;;  %vm1116_vm12 = vweird.f32 %v1898_v4 }
 0x2db   :  { %vm1117_vm14 = vmor %vm1115_vm13, %vm1116_vm12 }
 0x2dc   :  { %v1112_v6 = vsub.f32 1.0, %v1111_v5 }
 0x2de   :  { %v1113_v8 = vmul.f32 %v1898_v4, %v1112_v6 }
 0x2e0   :  { %v1114_v10 = vadd.f32 %v1898_v4, %v1113_v8 }
 0x2e2   :  { %v1118_v12 = vsel %vm1117_vm14, %v1898_v4, %v1114_v10 }
 0x2e3   :  { %v1123_v13 = vsel %vm1120_vm15, %v1122_v11, %v1118_v12 }
 0x2e4   :  { %v1125_v14 = vpack.c.bf16 %v1123_v13, %v1123_v13 }
 0x2e6   :  { %1202 = vmatmul.bf16.vlgmr.msra.gmra.mxu3 %v1125_v14 }
 0x369   :  { %v1203_v24 = vpop.f32.mrf.mxu3 }
 0x36a   :  { %v1204_v25 = vadd.f32 %v1881_v23, %v1203_v24 }
 0x36c   :  { %v1730_v26 = vmul.f32 -1.442695, %v1204_v25 }
 0x36e   :  { %1899 = vpow2.f32 %v1730_v26 }
 0x371   :  { %v1205_v27 = vpop.f32.mrf.mxu3 }
 0x374   :  { %v1900_v28 = vpop.eup %1899 }
 0x375   :  { %v1210_v29 = vadd.f32 1.0, %v1900_v28 }
 0x377   :  { %1901 = vrcp.f32 %v1210_v29  ;;  %v1222_v33 = vand.u32 2147483648, %v1210_v29  ;;  %v1220_v35 = vand.u32 2147483647, %v1210_v29  ;;  %vm1216_vm1 = vweird.f32 %v1210_v29 }
 0x379   :  { %v1223_v37 = vor.u32 1.1754944e-38, %v1222_v33  ;;  %vm1221_vm3 = vcmp.eq.f32.partialorder %v1220_v35, 8.507059e+37 }
 0x37d   :  { %v1902_v30 = vpop.eup %1901 }
 0x37e   :  { %v1212_v31 = vmul.f32 %v1902_v30, %v1210_v29  ;;  %vm1217_vm0 = vweird.f32 %v1902_v30 }
 0x37f   :  { %vm1218_vm2 = vmor %vm1216_vm1, %vm1217_vm0 }
 0x380   :  { %v1213_v32 = vsub.f32 1.0, %v1212_v31 }
 0x382   :  { %v1214_v34 = vmul.f32 %v1902_v30, %v1213_v32 }
 0x384   :  { %v1215_v36 = vadd.f32 %v1902_v30, %v1214_v34 }
 0x386   :  { %v1219_v38 = vsel %vm1218_vm2, %v1902_v30, %v1215_v36 }
 0x387   :  { %v1224_v39 = vsel %vm1221_vm3, %v1223_v37, %v1219_v38 }
 0x388   :  { %v1226_v40 = vpack.c.bf16 %v1224_v39, %v1224_v39 }
 0x38a   :  { %1303 = vmatmul.bf16.vlgmr.msrb.gmra.mxu0 %v1226_v40 }
 0x407   :  { %v1304_v42 = vpop.f32.mrf.mxu0 }
 0x408   :  { %v1305_v43 = vadd.f32 %v1882_v41, %v1304_v42 }
 0x40a   :  { %v1309_v44 = vsel %vm1308_vm4, %v1305_v43, -inf }
 0x40b   :  { %1310 = vmax.xlane.f32.xlu0 %v1309_v44 }
 0x40f   :  { %v1306_v45 = vpop.f32.mrf.mxu0 }
 0x47e   :  { %v1311_v46 = vpop.xlane.xlu0 %1310 }
 0x47f   :  { %v1312_v47 = vsub.f32 %v1305_v43, %v1311_v46 }
 0x481   :  { %v1313_v48 = vmul.f32 1.442695, %v1312_v47 }
 0x483   :  { %1903 = vpow2.f32 %v1313_v48 }
 0x489   :  { %v1904_v49 = vpop.eup %1903 }
 0x48a   :  { %v1315_v50 = vsel %vm1308_vm4, %v1904_v49, 0.0 }
 0x48b   :  { %1316 = vadd.xlane.f32.xlu0 %v1315_v50 }
 0x4fe   :  { %v1317_v51 = vpop.xlane.xlu0 %1316 }
 0x4ff   :  { %1905 = vlog2.f32 %v1317_v51 }
 0x505   :  { %v1906_v52 = vpop.eup %1905 }
 0x506   :  { %v1319_v53 = vmul.f32 0.6931472, %v1906_v52 }
 0x508   :  { %v1320_v54 = vsub.f32 %v1312_v47, %v1319_v53 }
 0x50a   :  { %1321 = vst [vmem:[#allocation14] sm:$0x3] %v1320_v54 }
 0x50b   :  { %1332 = dma.vmem_to_hbm [thread:$0]  %s1328_s9, 32, %s1330_s28, [#allocation4]  }
 0x50c   :  { %2107 = dma.done.wait [#allocation4], 32  }
 0x50d   :  { %2108 = vsyncadd [#allocation4], 4294967264 }
 0x50e   :  { %1337 = vsyncpa [#allocation3], 1 }
 0x50f   :  { %1338 = vsyncpa [#allocation6], 1 }
 0x510   :  { %1339 = vsyncpa [#allocation9], 1 }
 0x511   :  { %1340 = vsyncpa [#allocation12], 1 }
 0x512   :  { %1341 = vsyncpa [#allocation4], 1 }

</bundles_post_ra>
